<compile_context>
chip_gen: v5e
topology: v5e:2x2
jax: 0.10.0
libtpu: 0.0.40
codegen_flags: <defaults>
</compile_context>

<pallas_src>
import jax
import jax.numpy as jnp
import numpy as np
from jax.experimental import pallas as pl
from jax.experimental.pallas import tpu as pltpu

EMBED = 10    # embed_size
HIDDEN = 15   # hidden_size
VOCAB = 20    # vocab_size
SEQ = 5       # input_seq_size
MAXLEN = 30   # max_length (>= vocab_size)


def _decoder_kernel(
    # ---- scalar prefetch ----
    idx_seq_ref,      # SMEM (T,)        i32   per-step input token ids
    # ---- resident VMEM inputs (constant index maps -> DMA'd once) ----
    seq_row_ref,      # (1, S)           i32
    idx2_ref,         # (S, S)           f32   copy-alias mask (host precomputed)
    pre_state_ref,    # (1, H)           f32   initial hidden state
    pre_prob_c_ref,   # (1, S)           f32   initial copy probabilities
    enc_ref,          # (S, 2H)          f32   encoder outputs
    embed_ref,        # (V, E)           f32
    attn_we_ref,      # (E, S)           f32   attn weight, embed part
    attn_wh_ref,      # (H, S)           f32   attn weight, hidden part
    attn_b_ref,       # (1, S)           f32
    wih_ref,          # (3, 2, 2H, H)    f32   [gate r/z/n, input half attn/select]
    whh_ref,          # (3, H, H)        f32
    gru_b_ref,        # (2, 3, 1, H)     f32   [0]=b_ih, [1]=b_hh
    wo_ref,           # (H, V)           f32
    bo_ref,           # (1, V)           f32
    wc_ref,           # (2H, H)          f32
    bc_ref,           # (1, H)           f32
    # ---- per-step outputs ----
    prob_g_out_ref,   # block (1, 1, V)  f32
    state_out_ref,    # block (1, 1, H)  f32
    prob_c_out_ref,   # block (1, 1, S)  f32
    # ---- VMEM scratch (persists across grid steps) ----
    state_sc,         # (1, H)           f32   carried hidden state
    prob_c_sc,        # (1, S)           f32   carried copy probabilities
    scpre_sc,         # (S, H)           f32   tanh(enc @ Wc + bc), step-invariant
):
    f32 = jnp.float32
    t = pl.program_id(0)

    # ---- step-0 prologue: seed the carries, hoist step-invariant compute ----
    @pl.when(t == 0)
    def _init():
        state_sc[...] = pre_state_ref[...]
        prob_c_sc[...] = pre_prob_c_ref[...]
        scpre_sc[...] = jnp.tanh(
            jnp.dot(enc_ref[...], wc_ref[...], preferred_element_type=f32)
            + bc_ref[...])                                                     # (S, H)

    idx = idx_seq_ref[t]                    # current input token (SMEM scalar)
    h = state_sc[...]                       # (1, H) carried state
    pre_prob_c = prob_c_sc[...]             # (1, S) carried copy probs

    # ---- embedding lookup: dynamic sublane row load (no one-hot matmul) ----
    emb = embed_ref[pl.ds(idx, 1), :]                                          # (1, E)

    # ---- attention over encoder outputs ----
    # attn(cat([embed, state])) split into two dots (lane-concat free).
    attn_strength = (jnp.dot(emb, attn_we_ref[...], preferred_element_type=f32)
                     + jnp.dot(h, attn_wh_ref[...], preferred_element_type=f32)
                     + attn_b_ref[...])                                        # (1, S)
    m = jnp.max(attn_strength, axis=1, keepdims=True)
    e = jnp.exp(attn_strength - m)
    attn_weights = e * pl.reciprocal(jnp.sum(e, axis=1, keepdims=True),
                                     approx=True)                              # (1, S)

    enc = enc_ref[...]                                                         # (S, 2H)
    attn_applied = jnp.dot(attn_weights, enc, preferred_element_type=f32)      # (1, 2H)

    # ---- copy / select weights (data-dependent mask) ----
    seq_row = seq_row_ref[...]                                                 # (1, S) i32
    sel = (seq_row == idx).astype(f32)                                         # (1, S)
    ssum = jnp.sum(sel, axis=1, keepdims=True)                                 # (1, 1)
    sel = jnp.where(ssum > 1.0, sel / ssum, sel)
    select_weights = sel * pre_prob_c                                          # (1, S)
    select_applied = jnp.dot(select_weights, enc, preferred_element_type=f32)  # (1, 2H)

    # ---- single GRU step; input = cat([attn_applied, select_applied]) ----
    def gates(g):
        gi = (jnp.dot(attn_applied, wih_ref[g, 0], preferred_element_type=f32)
              + jnp.dot(select_applied, wih_ref[g, 1], preferred_element_type=f32)
              + gru_b_ref[0, g])
        gh = jnp.dot(h, whh_ref[g], preferred_element_type=f32) + gru_b_ref[1, g]
        return gi, gh

    gi_r, gh_r = gates(0)
    gi_z, gh_z = gates(1)
    gi_n, gh_n = gates(2)
    r = jax.nn.sigmoid(gi_r + gh_r)
    z = jax.nn.sigmoid(gi_z + gh_z)
    n = jnp.tanh(gi_n + r * gh_n)
    state = (1.0 - z) * n + z * h                                              # (1, H)

    # ---- generation / copy scores ----
    score_g = jnp.dot(state, wo_ref[...], preferred_element_type=f32) + bo_ref[...]   # (1, V)
    # score_c[0, i] = <scpre[i, :], state[0, :]>  (scpre hoisted to scratch)
    score_c = jax.lax.dot_general(state, scpre_sc[...],
                                  (((1,), (1,)), ((), ())),
                                  preferred_element_type=f32)                  # (1, S)

    # joint softmax over cat([score_g, score_c]) without a lane concat
    m2 = jnp.maximum(jnp.max(score_g, axis=1, keepdims=True),
                     jnp.max(score_c, axis=1, keepdims=True))
    eg = jnp.exp(score_g - m2)
    ec = jnp.exp(score_c - m2)
    inv = pl.reciprocal(jnp.sum(eg, axis=1, keepdims=True)
                        + jnp.sum(ec, axis=1, keepdims=True), approx=True)
    prob_g = eg * inv                                                          # (1, V)
    prob_c0 = ec * inv                                                         # (1, S)

    # prob_c = prob_c0 @ idx2  (idx2 step-invariant, resident)
    prob_c = jnp.dot(prob_c0, idx2_ref[...], preferred_element_type=f32)       # (1, S)

    # ---- carry + emit ----
    state_sc[...] = state
    prob_c_sc[...] = prob_c
    prob_g_out_ref[0] = prob_g
    state_out_ref[0] = state
    prob_c_out_ref[0] = prob_c


def _build_grid_spec(T):
    cmap2 = lambda t, idxs: (0, 0)
    cmap3 = lambda t, idxs: (0, 0, 0)
    cmap4 = lambda t, idxs: (0, 0, 0, 0)
    in_specs = [
        pl.BlockSpec((1, SEQ), cmap2),                       # seq_row
        pl.BlockSpec((SEQ, SEQ), cmap2),                     # idx2
        pl.BlockSpec((1, HIDDEN), cmap2),                    # pre_state
        pl.BlockSpec((1, SEQ), cmap2),                       # pre_prob_c
        pl.BlockSpec((SEQ, 2 * HIDDEN), cmap2),              # enc
        pl.BlockSpec((VOCAB, EMBED), cmap2),                 # embed
        pl.BlockSpec((EMBED, SEQ), cmap2),                   # attn_we
        pl.BlockSpec((HIDDEN, SEQ), cmap2),                  # attn_wh
        pl.BlockSpec((1, SEQ), cmap2),                       # attn_b
        pl.BlockSpec((3, 2, 2 * HIDDEN, HIDDEN), cmap4),     # wih
        pl.BlockSpec((3, HIDDEN, HIDDEN), cmap3),            # whh
        pl.BlockSpec((2, 3, 1, HIDDEN), cmap4),              # gru_b
        pl.BlockSpec((HIDDEN, VOCAB), cmap2),                # wo
        pl.BlockSpec((1, VOCAB), cmap2),                     # bo
        pl.BlockSpec((2 * HIDDEN, HIDDEN), cmap2),           # wc
        pl.BlockSpec((1, HIDDEN), cmap2),                    # bc
    ]
    omap = lambda t, idxs: (t, 0, 0)
    out_specs = (
        pl.BlockSpec((1, 1, VOCAB), omap),
        pl.BlockSpec((1, 1, HIDDEN), omap),
        pl.BlockSpec((1, 1, SEQ), omap),
    )
    return pltpu.PrefetchScalarGridSpec(
        num_scalar_prefetch=1,
        grid=(T,),
        in_specs=in_specs,
        out_specs=out_specs,
        scratch_shapes=[
            pltpu.VMEM((1, HIDDEN), jnp.float32),   # carried state
            pltpu.VMEM((1, SEQ), jnp.float32),      # carried prob_c
            pltpu.VMEM((SEQ, HIDDEN), jnp.float32), # tanh(enc@Wc+bc)
        ],
    )


@jax.jit
def decoder_decode(params, input_idx_seq, encoder_outputs, input_seq_idx,
                   pre_state, pre_prob_c):
    """Run T chained decoder steps in ONE pallas_call.
    input_idx_seq (T,) i32 | encoder_outputs (1,S,2H) | input_seq_idx (S,) i32 |
    pre_state (1,1,H) | pre_prob_c (1,S).
    Returns per-step (out (T,MAXLEN), state (T,H), prob_c (T,S))."""
    T = int(input_idx_seq.shape[0])
    enc = encoder_outputs.reshape(SEQ, 2 * HIDDEN).astype(jnp.float32)
    pre_state2 = pre_state.reshape(1, HIDDEN).astype(jnp.float32)
    pre_prob_c2 = pre_prob_c.reshape(1, SEQ).astype(jnp.float32)
    seq_row = input_seq_idx.reshape(1, SEQ).astype(jnp.int32)
    # torch builds idx_from_input2 with host numpy -> precompute it here too.
    idx2 = (input_seq_idx[None, :] == input_seq_idx[:, None]).astype(jnp.float32)
    idx_seq = input_idx_seq.reshape(T).astype(jnp.int32)

    out_shapes = (
        jax.ShapeDtypeStruct((T, 1, VOCAB), jnp.float32),
        jax.ShapeDtypeStruct((T, 1, HIDDEN), jnp.float32),
        jax.ShapeDtypeStruct((T, 1, SEQ), jnp.float32),
    )
    prob_g, state, prob_c = pl.pallas_call(
        _decoder_kernel,
        out_shape=out_shapes,
        grid_spec=_build_grid_spec(T),
        compiler_params=pltpu.CompilerParams(
            # Sequential dependence through the VMEM carries -> "arbitrary".
            # With multiple independent decode streams a leading "parallel"
            # batch axis would let v7x's two TensorCores split the work.
            dimension_semantics=("arbitrary",)),
    )(
        idx_seq, seq_row, idx2, pre_state2, pre_prob_c2, enc,
        params["embed"], params["attn_we"], params["attn_wh"], params["attn_b"],
        params["wih"], params["whh"], params["gru_b"],
        params["wo"], params["bo"], params["wc"], params["bc"],
    )
    prob_g = prob_g.reshape(T, VOCAB)
    state = state.reshape(T, HIDDEN)
    prob_c = prob_c.reshape(T, SEQ)
    # torch's `out` loop never fires (out starts at zero, guard always False),
    # so out == cat([prob_g, zeros]).
    out = jnp.concatenate(
        [prob_g, jnp.zeros((T, MAXLEN - VOCAB), jnp.float32)], axis=1)
    return out, state, prob_c


def decoder_forward(params, input_idx, encoder_outputs, input_seq_idx,
                    pre_state, pre_prob_c):
    """Single-step API matching the torch module forward signature."""
    out, state, prob_c = decoder_decode(
        params, input_idx.reshape(1).astype(jnp.int32), encoder_outputs,
        input_seq_idx, pre_state, pre_prob_c)
    return out[0:1], state[0:1], prob_c[0:1]


def init_params(key):
    ks = jax.random.split(key, 11)

    def rnd(k, shape, scale=0.1):
        return (scale * jax.random.normal(k, shape)).astype(jnp.float32)

    embed = rnd(ks[0], (VOCAB, EMBED))
    # attn: Linear(H+E -> S); pre-transposed, split into embed / hidden parts
    # matching the torch cat([embed(input), state]) ordering.
    attn_w = rnd(ks[1], (HIDDEN + EMBED, SEQ))
    attn_b = rnd(ks[2], (1, SEQ))
    # GRU (torch layout): weight_ih (3H, 4H), weight_hh (3H, H); gate order r, z, n.
    w_ih = rnd(ks[3], (3 * HIDDEN, 4 * HIDDEN))
    w_hh = rnd(ks[4], (3 * HIDDEN, HIDDEN))
    b_ih = rnd(ks[5], (3 * HIDDEN,))
    b_hh = rnd(ks[6], (3 * HIDDEN,))
    # kernel layout: wih (gate, input-half, 2H, H); whh (gate, H, H); biases packed.
    wih = jnp.transpose(w_ih.reshape(3, HIDDEN, 2, 2 * HIDDEN), (0, 2, 3, 1))
    whh = jnp.transpose(w_hh.reshape(3, HIDDEN, HIDDEN), (0, 2, 1))
    gru_b = jnp.stack([b_ih.reshape(3, 1, HIDDEN), b_hh.reshape(3, 1, HIDDEN)], axis=0)
    wo = rnd(ks[7], (HIDDEN, VOCAB))
    bo = rnd(ks[8], (1, VOCAB))
    wc = rnd(ks[9], (2 * HIDDEN, HIDDEN))
    bc = rnd(ks[10], (1, HIDDEN))
    # NOTE: attn_combine from __init__ is unused in forward and therefore omitted.
    params = dict(embed=embed, attn_we=attn_w[:EMBED], attn_wh=attn_w[EMBED:],
                  attn_b=attn_b, wih=wih, whh=whh, gru_b=gru_b,
                  wo=wo, bo=bo, wc=wc, bc=bc)
    raw = dict(attn_w=attn_w, w_ih=w_ih, w_hh=w_hh, b_ih=b_ih, b_hh=b_hh)
    return params, raw


def _decoder_step_ref(p, raw, idx, enc, input_seq_idx, h, pre_prob_c):
    """Pure-JAX reference mirroring the torch forward exactly (one step)."""
    H = HIDDEN
    emb = p["embed"][idx][None, :]
    attn_strength = jnp.concatenate([emb, h], axis=1) @ raw["attn_w"] + p["attn_b"]
    attn_weights = jax.nn.softmax(attn_strength, axis=1)
    attn_applied = attn_weights @ enc
    sel = (input_seq_idx == idx).astype(jnp.float32)[None, :]
    s = sel.sum()
    sel = jnp.where(s > 1, sel / s, sel)
    select_applied = (sel * pre_prob_c) @ enc
    x = jnp.concatenate([attn_applied, select_applied], axis=1)
    gi = x @ raw["w_ih"].T + raw["b_ih"]
    gh = h @ raw["w_hh"].T + raw["b_hh"]
    r = jax.nn.sigmoid(gi[:, :H] + gh[:, :H])
    z = jax.nn.sigmoid(gi[:, H:2 * H] + gh[:, H:2 * H])
    n = jnp.tanh(gi[:, 2 * H:] + r * gh[:, 2 * H:])
    state = (1 - z) * n + z * h
    score_g = state @ p["wo"] + p["bo"]
    score_c = jnp.tanh(enc @ p["wc"] + p["bc"])
    score_c = (score_c @ state.T).T
    prob = jax.nn.softmax(jnp.concatenate([score_g, score_c], axis=1), axis=1)
    prob_g, prob_c = prob[:, :VOCAB], prob[:, VOCAB:]
    idx2 = (input_seq_idx[None, :] == input_seq_idx[:, None]).astype(jnp.float32)
    prob_c = prob_c @ idx2
    out = jnp.concatenate([prob_g, jnp.zeros((1, MAXLEN - VOCAB))], axis=1)
    return out, state, prob_c


def decoder_decode_ref(p, raw, input_idx_seq, encoder_outputs, input_seq_idx,
                       pre_state, pre_prob_c):
    enc = encoder_outputs[0]
    h = pre_state.reshape(1, HIDDEN)
    pc = pre_prob_c
    outs, states, pcs = [], [], []
    for t in range(int(input_idx_seq.shape[0])):
        out, h, pc = _decoder_step_ref(p, raw, input_idx_seq[t], enc,
                                       input_seq_idx, h, pc)
        outs.append(out); states.append(h); pcs.append(pc)
    return (jnp.concatenate(outs, 0), jnp.concatenate(states, 0),
            jnp.concatenate(pcs, 0))


if __name__ == "__main__":
    key = jax.random.PRNGKey(0)
    kp, k1, k2 = jax.random.split(key, 3)
    params, raw = init_params(kp)

    T = 4
    # per-step decoder input tokens (must be < VOCAB for the embedding lookup)
    input_idx_seq = jnp.array([1, 5, 2, 7], dtype=jnp.int32)
    input_seq_idx = jnp.array([5, 2, 5, 20, 27], dtype=jnp.int32)
    encoder_outputs = jax.random.normal(k1, (1, SEQ, 2 * HIDDEN), dtype=jnp.float32)
    pre_state = jax.random.normal(k2, (1, 1, HIDDEN), dtype=jnp.float32)
    pre_prob_c = jnp.zeros((1, SEQ), dtype=jnp.float32)

    # fused T-step decode (single pallas_call, weights resident in VMEM)
    out, state, prob_c = decoder_decode(params, input_idx_seq, encoder_outputs,
                                        input_seq_idx, pre_state, pre_prob_c)
    jax.block_until_ready((out, state, prob_c))

    out_r, state_r, prob_c_r = decoder_decode_ref(
        params, raw, input_idx_seq, encoder_outputs, input_seq_idx,
        pre_state, pre_prob_c)

    assert out.shape == (T, MAXLEN)
    assert state.shape == (T, HIDDEN)
    assert prob_c.shape == (T, SEQ)
    np.testing.assert_allclose(np.asarray(out), np.asarray(out_r), atol=5e-3, rtol=5e-2)
    np.testing.assert_allclose(np.asarray(state), np.asarray(state_r), atol=5e-3, rtol=5e-2)
    np.testing.assert_allclose(np.asarray(prob_c), np.asarray(prob_c_r), atol=5e-3, rtol=5e-2)

    # single-step module-API check (T=1)
    out1, state1, prob_c1 = decoder_forward(params, input_idx_seq[:1],
                                            encoder_outputs, input_seq_idx,
                                            pre_state, pre_prob_c)
    jax.block_until_ready((out1, state1, prob_c1))
    assert out1.shape == (1, MAXLEN) and state1.shape == (1, HIDDEN) and prob_c1.shape == (1, SEQ)
    np.testing.assert_allclose(np.asarray(out1), np.asarray(out_r[:1]), atol=5e-3, rtol=5e-2)
    np.testing.assert_allclose(np.asarray(state1), np.asarray(state_r[:1]), atol=5e-3, rtol=5e-2)
    np.testing.assert_allclose(np.asarray(prob_c1), np.asarray(prob_c_r[:1]), atol=5e-3, rtol=5e-2)

    print("KERNEL_OK")
</pallas_src>

<mosaic_0001>
module attributes {stable_mosaic.version = 11 : i64} {
  func.func @_decoder_kernel(%arg0: i32, %arg1: memref<4xi32, #tpu.memory_space<smem>>, %arg2: memref<1x5xi32, #tpu.memory_space<vmem>>, %arg3: memref<5x5xf32, #tpu.memory_space<vmem>>, %arg4: memref<1x15xf32, #tpu.memory_space<vmem>>, %arg5: memref<1x5xf32, #tpu.memory_space<vmem>>, %arg6: memref<5x30xf32, #tpu.memory_space<vmem>>, %arg7: memref<20x10xf32, #tpu.memory_space<vmem>>, %arg8: memref<10x5xf32, #tpu.memory_space<vmem>>, %arg9: memref<15x5xf32, #tpu.memory_space<vmem>>, %arg10: memref<1x5xf32, #tpu.memory_space<vmem>>, %arg11: memref<3x2x30x15xf32, #tpu.memory_space<vmem>>, %arg12: memref<3x15x15xf32, #tpu.memory_space<vmem>>, %arg13: memref<2x3x1x15xf32, #tpu.memory_space<vmem>>, %arg14: memref<15x20xf32, #tpu.memory_space<vmem>>, %arg15: memref<1x20xf32, #tpu.memory_space<vmem>>, %arg16: memref<30x15xf32, #tpu.memory_space<vmem>>, %arg17: memref<1x15xf32, #tpu.memory_space<vmem>>, %arg18: memref<1x1x20xf32, #tpu.memory_space<vmem>>, %arg19: memref<1x1x15xf32, #tpu.memory_space<vmem>>, %arg20: memref<1x1x5xf32, #tpu.memory_space<vmem>>, %arg21: memref<1x15xf32, #tpu.memory_space<vmem>>, %arg22: memref<1x5xf32, #tpu.memory_space<vmem>>, %arg23: memref<5x15xf32, #tpu.memory_space<vmem>>) attributes {dimension_semantics = [#tpu.dimension_semantics<arbitrary>], iteration_bounds = array<i64: 4>, scalar_prefetch = 1 : i64, scratch_operands = 3 : i64, tpu.core_type = #tpu.core_type<tc>, window_params = [{pipeline_mode = #tpu.pipeline_mode<synchronous>, transform_indices = @transform_0, window_bounds = array<i64: 1, 5>}, {pipeline_mode = #tpu.pipeline_mode<synchronous>, transform_indices = @transform_1, window_bounds = array<i64: 5, 5>}, {pipeline_mode = #tpu.pipeline_mode<synchronous>, transform_indices = @transform_2, window_bounds = array<i64: 1, 15>}, {pipeline_mode = #tpu.pipeline_mode<synchronous>, transform_indices = @transform_3, window_bounds = array<i64: 1, 5>}, {pipeline_mode = #tpu.pipeline_mode<synchronous>, transform_indices = @transform_4, window_bounds = array<i64: 5, 30>}, {pipeline_mode = #tpu.pipeline_mode<synchronous>, transform_indices = @transform_5, window_bounds = array<i64: 20, 10>}, {pipeline_mode = #tpu.pipeline_mode<synchronous>, transform_indices = @transform_6, window_bounds = array<i64: 10, 5>}, {pipeline_mode = #tpu.pipeline_mode<synchronous>, transform_indices = @transform_7, window_bounds = array<i64: 15, 5>}, {pipeline_mode = #tpu.pipeline_mode<synchronous>, transform_indices = @transform_8, window_bounds = array<i64: 1, 5>}, {pipeline_mode = #tpu.pipeline_mode<synchronous>, transform_indices = @transform_9, window_bounds = array<i64: 3, 2, 30, 15>}, {pipeline_mode = #tpu.pipeline_mode<synchronous>, transform_indices = @transform_10, window_bounds = array<i64: 3, 15, 15>}, {pipeline_mode = #tpu.pipeline_mode<synchronous>, transform_indices = @transform_11, window_bounds = array<i64: 2, 3, 1, 15>}, {pipeline_mode = #tpu.pipeline_mode<synchronous>, transform_indices = @transform_12, window_bounds = array<i64: 15, 20>}, {pipeline_mode = #tpu.pipeline_mode<synchronous>, transform_indices = @transform_13, window_bounds = array<i64: 1, 20>}, {pipeline_mode = #tpu.pipeline_mode<synchronous>, transform_indices = @transform_14, window_bounds = array<i64: 30, 15>}, {pipeline_mode = #tpu.pipeline_mode<synchronous>, transform_indices = @transform_15, window_bounds = array<i64: 1, 15>}, {transform_indices = @transform_16, window_bounds = array<i64: 1, 1, 20>}, {transform_indices = @transform_17, window_bounds = array<i64: 1, 1, 15>}, {transform_indices = @transform_18, window_bounds = array<i64: 1, 1, 5>}]} {
    %c0_i32 = arith.constant 0 : i32
    %0 = arith.cmpi eq, %arg0, %c0_i32 : i32
    %1 = arith.extui %0 : i1 to i32
    %c0_i32_0 = arith.constant 0 : i32
    %2 = arith.cmpi ne, %1, %c0_i32_0 : i32
    scf.if %2 {
      %c0_117 = arith.constant 0 : index
      %c0_118 = arith.constant 0 : index
      %152 = vector.load %arg4[%c0_117, %c0_118] : memref<1x15xf32, #tpu.memory_space<vmem>>, vector<1x15xf32>
      %c0_119 = arith.constant 0 : index
      %c0_120 = arith.constant 0 : index
      %153 = vector.load %arg21[%c0_119, %c0_120] : memref<1x15xf32, #tpu.memory_space<vmem>>, vector<1x15xf32>
      tpu.vector_store %arg21[%c0_119, %c0_120], %152 {strides = array<i32>} : memref<1x15xf32, #tpu.memory_space<vmem>>, vector<1x15xf32>,
      %c0_121 = arith.constant 0 : index
      %c0_122 = arith.constant 0 : index
      %154 = vector.load %arg5[%c0_121, %c0_122] : memref<1x5xf32, #tpu.memory_space<vmem>>, vector<1x5xf32>
      %c0_123 = arith.constant 0 : index
      %c0_124 = arith.constant 0 : index
      %155 = vector.load %arg22[%c0_123, %c0_124] : memref<1x5xf32, #tpu.memory_space<vmem>>, vector<1x5xf32>
      tpu.vector_store %arg22[%c0_123, %c0_124], %154 {strides = array<i32>} : memref<1x5xf32, #tpu.memory_space<vmem>>, vector<1x5xf32>,
      %c0_125 = arith.constant 0 : index
      %c0_126 = arith.constant 0 : index
      %156 = vector.load %arg6[%c0_125, %c0_126] : memref<5x30xf32, #tpu.memory_space<vmem>>, vector<5x30xf32>
      %c0_127 = arith.constant 0 : index
      %c0_128 = arith.constant 0 : index
      %157 = vector.load %arg16[%c0_127, %c0_128] : memref<30x15xf32, #tpu.memory_space<vmem>>, vector<30x15xf32>
      %cst_129 = arith.constant dense<0.000000e+00> : vector<5x15xf32>
      %158 = tpu.matmul %156, %157, %cst_129 {dimension_numbers = #tpu.dot_dimension_numbers<[1], [0], [0], [1], [0, 0, 1, 1], [], []>} : vector<5x30xf32>, vector<30x15xf32>, vector<5x15xf32> -> vector<5x15xf32>
      %c0_130 = arith.constant 0 : index
      %c0_131 = arith.constant 0 : index
      %159 = vector.load %arg17[%c0_130, %c0_131] : memref<1x15xf32, #tpu.memory_space<vmem>>, vector<1x15xf32>
      %160 = vector.broadcast %159 : vector<1x15xf32> to vector<5x15xf32>
      %161 = arith.addf %158, %160 : vector<5x15xf32>
      %162 = math.tanh %161 : vector<5x15xf32>
      %c0_132 = arith.constant 0 : index
      %c0_133 = arith.constant 0 : index
      %163 = vector.load %arg23[%c0_132, %c0_133] : memref<5x15xf32, #tpu.memory_space<vmem>>, vector<5x15xf32>
      tpu.vector_store %arg23[%c0_132, %c0_133], %162 {strides = array<i32>} : memref<5x15xf32, #tpu.memory_space<vmem>>, vector<5x15xf32>,
    } else {
    }
    %3 = arith.index_cast %arg0 : i32 to index
    %4 = memref.load %arg1[%3] : memref<4xi32, #tpu.memory_space<smem>>
    %c0 = arith.constant 0 : index
    %c0_1 = arith.constant 0 : index
    %5 = vector.load %arg21[%c0, %c0_1] : memref<1x15xf32, #tpu.memory_space<vmem>>, vector<1x15xf32>
    %c0_2 = arith.constant 0 : index
    %c0_3 = arith.constant 0 : index
    %6 = vector.load %arg22[%c0_2, %c0_3] : memref<1x5xf32, #tpu.memory_space<vmem>>, vector<1x5xf32>
    %7 = arith.index_cast %4 : i32 to index
    %c0_4 = arith.constant 0 : index
    %8 = vector.load %arg7[%7, %c0_4] : memref<20x10xf32, #tpu.memory_space<vmem>>, vector<1x10xf32>
    %c0_5 = arith.constant 0 : index
    %c0_6 = arith.constant 0 : index
    %9 = vector.load %arg8[%c0_5, %c0_6] : memref<10x5xf32, #tpu.memory_space<vmem>>, vector<10x5xf32>
    %cst = arith.constant dense<0.000000e+00> : vector<1x5xf32>
    %10 = tpu.matmul %8, %9, %cst {dimension_numbers = #tpu.dot_dimension_numbers<[1], [0], [0], [1], [0, 0, 1, 1], [], []>} : vector<1x10xf32>, vector<10x5xf32>, vector<1x5xf32> -> vector<1x5xf32>
    %c0_7 = arith.constant 0 : index
    %c0_8 = arith.constant 0 : index
    %11 = vector.load %arg9[%c0_7, %c0_8] : memref<15x5xf32, #tpu.memory_space<vmem>>, vector<15x5xf32>
    %cst_9 = arith.constant dense<0.000000e+00> : vector<1x5xf32>
    %12 = tpu.matmul %5, %11, %cst_9 {dimension_numbers = #tpu.dot_dimension_numbers<[1], [0], [0], [1], [0, 0, 1, 1], [], []>} : vector<1x15xf32>, vector<15x5xf32>, vector<1x5xf32> -> vector<1x5xf32>
    %13 = arith.addf %10, %12 : vector<1x5xf32>
    %c0_10 = arith.constant 0 : index
    %c0_11 = arith.constant 0 : index
    %14 = vector.load %arg10[%c0_10, %c0_11] : memref<1x5xf32, #tpu.memory_space<vmem>>, vector<1x5xf32>
    %15 = arith.addf %13, %14 : vector<1x5xf32>
    %cst_12 = arith.constant dense<0xFF800000> : vector<1xf32>
    %16 = vector.multi_reduction <maximumf>, %15, %cst_12 [1] : vector<1x5xf32> to vector<1xf32>
    %17 = vector.shape_cast %16 : vector<1xf32> to vector<1x1xf32>
    %18 = vector.broadcast %17 : vector<1x1xf32> to vector<1x5xf32>
    %19 = arith.subf %15, %18 : vector<1x5xf32>
    %20 = math.exp %19 : vector<1x5xf32>
    %cst_13 = arith.constant dense<0.000000e+00> : vector<1xf32>
    %21 = vector.multi_reduction <add>, %20, %cst_13 [1] : vector<1x5xf32> to vector<1xf32>
    %22 = vector.shape_cast %21 : vector<1xf32> to vector<1x1xf32>
    %23 = tpu.reciprocal %22 {approx = true} : vector<1x1xf32> -> vector<1x1xf32>
    %24 = vector.broadcast %23 : vector<1x1xf32> to vector<1x5xf32>
    %25 = arith.mulf %20, %24 : vector<1x5xf32>
    %c0_14 = arith.constant 0 : index
    %c0_15 = arith.constant 0 : index
    %26 = vector.load %arg6[%c0_14, %c0_15] : memref<5x30xf32, #tpu.memory_space<vmem>>, vector<5x30xf32>
    %cst_16 = arith.constant dense<0.000000e+00> : vector<1x30xf32>
    %27 = tpu.matmul %25, %26, %cst_16 {dimension_numbers = #tpu.dot_dimension_numbers<[1], [0], [0], [1], [0, 0, 1, 1], [], []>} : vector<1x5xf32>, vector<5x30xf32>, vector<1x30xf32> -> vector<1x30xf32>
    %c0_17 = arith.constant 0 : index
    %c0_18 = arith.constant 0 : index
    %28 = vector.load %arg2[%c0_17, %c0_18] : memref<1x5xi32, #tpu.memory_space<vmem>>, vector<1x5xi32>
    %29 = vector.broadcast %4 : i32 to vector<1x5xi32>
    %30 = arith.cmpi eq, %28, %29 : vector<1x5xi32>
    %31 = arith.extui %30 : vector<1x5xi1> to vector<1x5xi32>
    %32 = arith.sitofp %31 : vector<1x5xi32> to vector<1x5xf32>
    %cst_19 = arith.constant dense<0.000000e+00> : vector<1xf32>
    %33 = vector.multi_reduction <add>, %32, %cst_19 [1] : vector<1x5xf32> to vector<1xf32>
    %34 = vector.shape_cast %33 : vector<1xf32> to vector<1x1xf32>
    %cst_20 = arith.constant 1.000000e+00 : f32
    %35 = vector.broadcast %cst_20 : f32 to vector<1x1xf32>
    %36 = arith.cmpf ogt, %34, %35 : vector<1x1xf32>
    %37 = vector.broadcast %34 : vector<1x1xf32> to vector<1x5xf32>
    %38 = arith.divf %32, %37 : vector<1x5xf32>
    %39 = vector.shape_cast %36 : vector<1x1xi1> to vector<1x1xi1>
    %40 = vector.broadcast %39 : vector<1x1xi1> to vector<1x5xi1>
    %41 = arith.select %40, %38, %32 : vector<1x5xi1>, vector<1x5xf32>
    %42 = arith.mulf %41, %6 : vector<1x5xf32>
    %cst_21 = arith.constant dense<0.000000e+00> : vector<1x30xf32>
    %43 = tpu.matmul %42, %26, %cst_21 {dimension_numbers = #tpu.dot_dimension_numbers<[1], [0], [0], [1], [0, 0, 1, 1], [], []>} : vector<1x5xf32>, vector<5x30xf32>, vector<1x30xf32> -> vector<1x30xf32>
    %c0_22 = arith.constant 0 : index
    %c0_23 = arith.constant 0 : index
    %c0_24 = arith.constant 0 : index
    %c0_25 = arith.constant 0 : index
    %44 = vector.load %arg11[%c0_22, %c0_23, %c0_24, %c0_25] : memref<3x2x30x15xf32, #tpu.memory_space<vmem>>, vector<1x1x30x15xf32>
    %45 = vector.shape_cast %44 : vector<1x1x30x15xf32> to vector<30x15xf32>
    %cst_26 = arith.constant dense<0.000000e+00> : vector<1x15xf32>
    %46 = tpu.matmul %27, %45, %cst_26 {dimension_numbers = #tpu.dot_dimension_numbers<[1], [0], [0], [1], [0, 0, 1, 1], [], []>} : vector<1x30xf32>, vector<30x15xf32>, vector<1x15xf32> -> vector<1x15xf32>
    %c0_27 = arith.constant 0 : index
    %c1 = arith.constant 1 : index
    %c0_28 = arith.constant 0 : index
    %c0_29 = arith.constant 0 : index
    %47 = vector.load %arg11[%c0_27, %c1, %c0_28, %c0_29] : memref<3x2x30x15xf32, #tpu.memory_space<vmem>>, vector<1x1x30x15xf32>
    %48 = vector.shape_cast %47 : vector<1x1x30x15xf32> to vector<30x15xf32>
    %cst_30 = arith.constant dense<0.000000e+00> : vector<1x15xf32>
    %49 = tpu.matmul %43, %48, %cst_30 {dimension_numbers = #tpu.dot_dimension_numbers<[1], [0], [0], [1], [0, 0, 1, 1], [], []>} : vector<1x30xf32>, vector<30x15xf32>, vector<1x15xf32> -> vector<1x15xf32>
    %50 = arith.addf %46, %49 : vector<1x15xf32>
    %c0_31 = arith.constant 0 : index
    %c0_32 = arith.constant 0 : index
    %c0_33 = arith.constant 0 : index
    %c0_34 = arith.constant 0 : index
    %51 = vector.load %arg13[%c0_31, %c0_32, %c0_33, %c0_34] : memref<2x3x1x15xf32, #tpu.memory_space<vmem>>, vector<1x1x1x15xf32>
    %52 = vector.shape_cast %51 : vector<1x1x1x15xf32> to vector<1x15xf32>
    %53 = arith.addf %50, %52 : vector<1x15xf32>
    %c0_35 = arith.constant 0 : index
    %c0_36 = arith.constant 0 : index
    %c0_37 = arith.constant 0 : index
    %54 = vector.load %arg12[%c0_35, %c0_36, %c0_37] : memref<3x15x15xf32, #tpu.memory_space<vmem>>, vector<1x15x15xf32>
    %55 = vector.shape_cast %54 : vector<1x15x15xf32> to vector<15x15xf32>
    %cst_38 = arith.constant dense<0.000000e+00> : vector<1x15xf32>
    %56 = tpu.matmul %5, %55, %cst_38 {dimension_numbers = #tpu.dot_dimension_numbers<[1], [0], [0], [1], [0, 0, 1, 1], [], []>} : vector<1x15xf32>, vector<15x15xf32>, vector<1x15xf32> -> vector<1x15xf32>
    %c1_39 = arith.constant 1 : index
    %c0_40 = arith.constant 0 : index
    %c0_41 = arith.constant 0 : index
    %c0_42 = arith.constant 0 : index
    %57 = vector.load %arg13[%c1_39, %c0_40, %c0_41, %c0_42] : memref<2x3x1x15xf32, #tpu.memory_space<vmem>>, vector<1x1x1x15xf32>
    %58 = vector.shape_cast %57 : vector<1x1x1x15xf32> to vector<1x15xf32>
    %59 = arith.addf %56, %58 : vector<1x15xf32>
    %c1_43 = arith.constant 1 : index
    %c0_44 = arith.constant 0 : index
    %c0_45 = arith.constant 0 : index
    %c0_46 = arith.constant 0 : index
    %60 = vector.load %arg11[%c1_43, %c0_44, %c0_45, %c0_46] : memref<3x2x30x15xf32, #tpu.memory_space<vmem>>, vector<1x1x30x15xf32>
    %61 = vector.shape_cast %60 : vector<1x1x30x15xf32> to vector<30x15xf32>
    %cst_47 = arith.constant dense<0.000000e+00> : vector<1x15xf32>
    %62 = tpu.matmul %27, %61, %cst_47 {dimension_numbers = #tpu.dot_dimension_numbers<[1], [0], [0], [1], [0, 0, 1, 1], [], []>} : vector<1x30xf32>, vector<30x15xf32>, vector<1x15xf32> -> vector<1x15xf32>
    %c1_48 = arith.constant 1 : index
    %c1_49 = arith.constant 1 : index
    %c0_50 = arith.constant 0 : index
    %c0_51 = arith.constant 0 : index
    %63 = vector.load %arg11[%c1_48, %c1_49, %c0_50, %c0_51] : memref<3x2x30x15xf32, #tpu.memory_space<vmem>>, vector<1x1x30x15xf32>
    %64 = vector.shape_cast %63 : vector<1x1x30x15xf32> to vector<30x15xf32>
    %cst_52 = arith.constant dense<0.000000e+00> : vector<1x15xf32>
    %65 = tpu.matmul %43, %64, %cst_52 {dimension_numbers = #tpu.dot_dimension_numbers<[1], [0], [0], [1], [0, 0, 1, 1], [], []>} : vector<1x30xf32>, vector<30x15xf32>, vector<1x15xf32> -> vector<1x15xf32>
    %66 = arith.addf %62, %65 : vector<1x15xf32>
    %c0_53 = arith.constant 0 : index
    %c1_54 = arith.constant 1 : index
    %c0_55 = arith.constant 0 : index
    %c0_56 = arith.constant 0 : index
    %67 = vector.load %arg13[%c0_53, %c1_54, %c0_55, %c0_56] : memref<2x3x1x15xf32, #tpu.memory_space<vmem>>, vector<1x1x1x15xf32>
    %68 = vector.shape_cast %67 : vector<1x1x1x15xf32> to vector<1x15xf32>
    %69 = arith.addf %66, %68 : vector<1x15xf32>
    %c1_57 = arith.constant 1 : index
    %c0_58 = arith.constant 0 : index
    %c0_59 = arith.constant 0 : index
    %70 = vector.load %arg12[%c1_57, %c0_58, %c0_59] : memref<3x15x15xf32, #tpu.memory_space<vmem>>, vector<1x15x15xf32>
    %71 = vector.shape_cast %70 : vector<1x15x15xf32> to vector<15x15xf32>
    %cst_60 = arith.constant dense<0.000000e+00> : vector<1x15xf32>
    %72 = tpu.matmul %5, %71, %cst_60 {dimension_numbers = #tpu.dot_dimension_numbers<[1], [0], [0], [1], [0, 0, 1, 1], [], []>} : vector<1x15xf32>, vector<15x15xf32>, vector<1x15xf32> -> vector<1x15xf32>
    %c1_61 = arith.constant 1 : index
    %c1_62 = arith.constant 1 : index
    %c0_63 = arith.constant 0 : index
    %c0_64 = arith.constant 0 : index
    %73 = vector.load %arg13[%c1_61, %c1_62, %c0_63, %c0_64] : memref<2x3x1x15xf32, #tpu.memory_space<vmem>>, vector<1x1x1x15xf32>
    %74 = vector.shape_cast %73 : vector<1x1x1x15xf32> to vector<1x15xf32>
    %75 = arith.addf %72, %74 : vector<1x15xf32>
    %c2 = arith.constant 2 : index
    %c0_65 = arith.constant 0 : index
    %c0_66 = arith.constant 0 : index
    %c0_67 = arith.constant 0 : index
    %76 = vector.load %arg11[%c2, %c0_65, %c0_66, %c0_67] : memref<3x2x30x15xf32, #tpu.memory_space<vmem>>, vector<1x1x30x15xf32>
    %77 = vector.shape_cast %76 : vector<1x1x30x15xf32> to vector<30x15xf32>
    %cst_68 = arith.constant dense<0.000000e+00> : vector<1x15xf32>
    %78 = tpu.matmul %27, %77, %cst_68 {dimension_numbers = #tpu.dot_dimension_numbers<[1], [0], [0], [1], [0, 0, 1, 1], [], []>} : vector<1x30xf32>, vector<30x15xf32>, vector<1x15xf32> -> vector<1x15xf32>
    %c2_69 = arith.constant 2 : index
    %c1_70 = arith.constant 1 : index
    %c0_71 = arith.constant 0 : index
    %c0_72 = arith.constant 0 : index
    %79 = vector.load %arg11[%c2_69, %c1_70, %c0_71, %c0_72] : memref<3x2x30x15xf32, #tpu.memory_space<vmem>>, vector<1x1x30x15xf32>
    %80 = vector.shape_cast %79 : vector<1x1x30x15xf32> to vector<30x15xf32>
    %cst_73 = arith.constant dense<0.000000e+00> : vector<1x15xf32>
    %81 = tpu.matmul %43, %80, %cst_73 {dimension_numbers = #tpu.dot_dimension_numbers<[1], [0], [0], [1], [0, 0, 1, 1], [], []>} : vector<1x30xf32>, vector<30x15xf32>, vector<1x15xf32> -> vector<1x15xf32>
    %82 = arith.addf %78, %81 : vector<1x15xf32>
    %c0_74 = arith.constant 0 : index
    %c2_75 = arith.constant 2 : index
    %c0_76 = arith.constant 0 : index
    %c0_77 = arith.constant 0 : index
    %83 = vector.load %arg13[%c0_74, %c2_75, %c0_76, %c0_77] : memref<2x3x1x15xf32, #tpu.memory_space<vmem>>, vector<1x1x1x15xf32>
    %84 = vector.shape_cast %83 : vector<1x1x1x15xf32> to vector<1x15xf32>
    %85 = arith.addf %82, %84 : vector<1x15xf32>
    %c2_78 = arith.constant 2 : index
    %c0_79 = arith.constant 0 : index
    %c0_80 = arith.constant 0 : index
    %86 = vector.load %arg12[%c2_78, %c0_79, %c0_80] : memref<3x15x15xf32, #tpu.memory_space<vmem>>, vector<1x15x15xf32>
    %87 = vector.shape_cast %86 : vector<1x15x15xf32> to vector<15x15xf32>
    %cst_81 = arith.constant dense<0.000000e+00> : vector<1x15xf32>
    %88 = tpu.matmul %5, %87, %cst_81 {dimension_numbers = #tpu.dot_dimension_numbers<[1], [0], [0], [1], [0, 0, 1, 1], [], []>} : vector<1x15xf32>, vector<15x15xf32>, vector<1x15xf32> -> vector<1x15xf32>
    %c1_82 = arith.constant 1 : index
    %c2_83 = arith.constant 2 : index
    %c0_84 = arith.constant 0 : index
    %c0_85 = arith.constant 0 : index
    %89 = vector.load %arg13[%c1_82, %c2_83, %c0_84, %c0_85] : memref<2x3x1x15xf32, #tpu.memory_space<vmem>>, vector<1x1x1x15xf32>
    %90 = vector.shape_cast %89 : vector<1x1x1x15xf32> to vector<1x15xf32>
    %91 = arith.addf %88, %90 : vector<1x15xf32>
    %92 = arith.addf %53, %59 : vector<1x15xf32>
    %93 = arith.negf %92 : vector<1x15xf32>
    %94 = math.exp %93 : vector<1x15xf32>
    %cst_86 = arith.constant 1.000000e+00 : f32
    %95 = vector.broadcast %cst_86 : f32 to vector<1x15xf32>
    %96 = arith.addf %95, %94 : vector<1x15xf32>
    %97 = arith.divf %95, %96 : vector<1x15xf32>
    %98 = arith.addf %69, %75 : vector<1x15xf32>
    %99 = arith.negf %98 : vector<1x15xf32>
    %100 = math.exp %99 : vector<1x15xf32>
    %cst_87 = arith.constant 1.000000e+00 : f32
    %101 = vector.broadcast %cst_87 : f32 to vector<1x15xf32>
    %102 = arith.addf %101, %100 : vector<1x15xf32>
    %103 = arith.divf %101, %102 : vector<1x15xf32>
    %104 = arith.mulf %97, %91 : vector<1x15xf32>
    %105 = arith.addf %85, %104 : vector<1x15xf32>
    %106 = math.tanh %105 : vector<1x15xf32>
    %cst_88 = arith.constant 1.000000e+00 : f32
    %107 = vector.broadcast %cst_88 : f32 to vector<1x15xf32>
    %108 = arith.subf %107, %103 : vector<1x15xf32>
    %109 = arith.mulf %108, %106 : vector<1x15xf32>
    %110 = arith.mulf %103, %5 : vector<1x15xf32>
    %111 = arith.addf %109, %110 : vector<1x15xf32>
    %c0_89 = arith.constant 0 : index
    %c0_90 = arith.constant 0 : index
    %112 = vector.load %arg14[%c0_89, %c0_90] : memref<15x20xf32, #tpu.memory_space<vmem>>, vector<15x20xf32>
    %cst_91 = arith.constant dense<0.000000e+00> : vector<1x20xf32>
    %113 = tpu.matmul %111, %112, %cst_91 {dimension_numbers = #tpu.dot_dimension_numbers<[1], [0], [0], [1], [0, 0, 1, 1], [], []>} : vector<1x15xf32>, vector<15x20xf32>, vector<1x20xf32> -> vector<1x20xf32>
    %c0_92 = arith.constant 0 : index
    %c0_93 = arith.constant 0 : index
    %114 = vector.load %arg15[%c0_92, %c0_93] : memref<1x20xf32, #tpu.memory_space<vmem>>, vector<1x20xf32>
    %115 = arith.addf %113, %114 : vector<1x20xf32>
    %c0_94 = arith.constant 0 : index
    %c0_95 = arith.constant 0 : index
    %116 = vector.load %arg23[%c0_94, %c0_95] : memref<5x15xf32, #tpu.memory_space<vmem>>, vector<5x15xf32>
    %cst_96 = arith.constant dense<0.000000e+00> : vector<1x5xf32>
    %117 = tpu.matmul %111, %116, %cst_96 {dimension_numbers = #tpu.dot_dimension_numbers<[1], [1], [0], [0], [0, 0, 1, 0], [], []>} : vector<1x15xf32>, vector<5x15xf32>, vector<1x5xf32> -> vector<1x5xf32>
    %cst_97 = arith.constant dense<0xFF800000> : vector<1xf32>
    %118 = vector.multi_reduction <maximumf>, %115, %cst_97 [1] : vector<1x20xf32> to vector<1xf32>
    %119 = vector.shape_cast %118 : vector<1xf32> to vector<1x1xf32>
    %cst_98 = arith.constant dense<0xFF800000> : vector<1xf32>
    %120 = vector.multi_reduction <maximumf>, %117, %cst_98 [1] : vector<1x5xf32> to vector<1xf32>
    %121 = vector.shape_cast %120 : vector<1xf32> to vector<1x1xf32>
    %122 = arith.maximumf %119, %121 : vector<1x1xf32>
    %123 = vector.broadcast %122 : vector<1x1xf32> to vector<1x20xf32>
    %124 = arith.subf %115, %123 : vector<1x20xf32>
    %125 = math.exp %124 : vector<1x20xf32>
    %126 = vector.broadcast %122 : vector<1x1xf32> to vector<1x5xf32>
    %127 = arith.subf %117, %126 : vector<1x5xf32>
    %128 = math.exp %127 : vector<1x5xf32>
    %cst_99 = arith.constant dense<0.000000e+00> : vector<1xf32>
    %129 = vector.multi_reduction <add>, %125, %cst_99 [1] : vector<1x20xf32> to vector<1xf32>
    %130 = vector.shape_cast %129 : vector<1xf32> to vector<1x1xf32>
    %cst_100 = arith.constant dense<0.000000e+00> : vector<1xf32>
    %131 = vector.multi_reduction <add>, %128, %cst_100 [1] : vector<1x5xf32> to vector<1xf32>
    %132 = vector.shape_cast %131 : vector<1xf32> to vector<1x1xf32>
    %133 = arith.addf %130, %132 : vector<1x1xf32>
    %134 = tpu.reciprocal %133 {approx = true} : vector<1x1xf32> -> vector<1x1xf32>
    %135 = vector.broadcast %134 : vector<1x1xf32> to vector<1x20xf32>
    %136 = arith.mulf %125, %135 : vector<1x20xf32>
    %137 = vector.broadcast %134 : vector<1x1xf32> to vector<1x5xf32>
    %138 = arith.mulf %128, %137 : vector<1x5xf32>
    %c0_101 = arith.constant 0 : index
    %c0_102 = arith.constant 0 : index
    %139 = vector.load %arg3[%c0_101, %c0_102] : memref<5x5xf32, #tpu.memory_space<vmem>>, vector<5x5xf32>
    %cst_103 = arith.constant dense<0.000000e+00> : vector<1x5xf32>
    %140 = tpu.matmul %138, %139, %cst_103 {dimension_numbers = #tpu.dot_dimension_numbers<[1], [0], [0], [1], [0, 0, 1, 1], [], []>} : vector<1x5xf32>, vector<5x5xf32>, vector<1x5xf32> -> vector<1x5xf32>
    %c0_104 = arith.constant 0 : index
    %c0_105 = arith.constant 0 : index
    %141 = vector.load %arg21[%c0_104, %c0_105] : memref<1x15xf32, #tpu.memory_space<vmem>>, vector<1x15xf32>
    tpu.vector_store %arg21[%c0_104, %c0_105], %111 {strides = array<i32>} : memref<1x15xf32, #tpu.memory_space<vmem>>, vector<1x15xf32>,
    %c0_106 = arith.constant 0 : index
    %c0_107 = arith.constant 0 : index
    %142 = vector.load %arg22[%c0_106, %c0_107] : memref<1x5xf32, #tpu.memory_space<vmem>>, vector<1x5xf32>
    tpu.vector_store %arg22[%c0_106, %c0_107], %140 {strides = array<i32>} : memref<1x5xf32, #tpu.memory_space<vmem>>, vector<1x5xf32>,
    %c0_108 = arith.constant 0 : index
    %c0_109 = arith.constant 0 : index
    %c0_110 = arith.constant 0 : index
    %143 = vector.load %arg18[%c0_108, %c0_109, %c0_110] : memref<1x1x20xf32, #tpu.memory_space<vmem>>, vector<1x1x20xf32>
    %144 = vector.shape_cast %143 : vector<1x1x20xf32> to vector<1x20xf32>
    %145 = vector.shape_cast %136 : vector<1x20xf32> to vector<1x1x20xf32>
    tpu.vector_store %arg18[%c0_108, %c0_109, %c0_110], %145 {strides = array<i32>} : memref<1x1x20xf32, #tpu.memory_space<vmem>>, vector<1x1x20xf32>,
    %c0_111 = arith.constant 0 : index
    %c0_112 = arith.constant 0 : index
    %c0_113 = arith.constant 0 : index
    %146 = vector.load %arg19[%c0_111, %c0_112, %c0_113] : memref<1x1x15xf32, #tpu.memory_space<vmem>>, vector<1x1x15xf32>
    %147 = vector.shape_cast %146 : vector<1x1x15xf32> to vector<1x15xf32>
    %148 = vector.shape_cast %111 : vector<1x15xf32> to vector<1x1x15xf32>
    tpu.vector_store %arg19[%c0_111, %c0_112, %c0_113], %148 {strides = array<i32>} : memref<1x1x15xf32, #tpu.memory_space<vmem>>, vector<1x1x15xf32>,
    %c0_114 = arith.constant 0 : index
    %c0_115 = arith.constant 0 : index
    %c0_116 = arith.constant 0 : index
    %149 = vector.load %arg20[%c0_114, %c0_115, %c0_116] : memref<1x1x5xf32, #tpu.memory_space<vmem>>, vector<1x1x5xf32>
    %150 = vector.shape_cast %149 : vector<1x1x5xf32> to vector<1x5xf32>
    %151 = vector.shape_cast %140 : vector<1x5xf32> to vector<1x1x5xf32>
    tpu.vector_store %arg20[%c0_114, %c0_115, %c0_116], %151 {strides = array<i32>} : memref<1x1x5xf32, #tpu.memory_space<vmem>>, vector<1x1x5xf32>,
    return
  }
  func.func @transform_0(%arg0: i32, %arg1: memref<4xi32, #tpu.memory_space<smem>>) -> (i32, i32) {
    %c0_i32 = arith.constant 0 : i32
    %c0_i32_0 = arith.constant 0 : i32
    %c0_i32_1 = arith.constant 0 : i32
    return %c0_i32, %c0_i32_0 : i32, i32
  }
  func.func @transform_1(%arg0: i32, %arg1: memref<4xi32, #tpu.memory_space<smem>>) -> (i32, i32) {
    %c0_i32 = arith.constant 0 : i32
    %c0_i32_0 = arith.constant 0 : i32
    %c0_i32_1 = arith.constant 0 : i32
    return %c0_i32, %c0_i32_0 : i32, i32
  }
  func.func @transform_2(%arg0: i32, %arg1: memref<4xi32, #tpu.memory_space<smem>>) -> (i32, i32) {
    %c0_i32 = arith.constant 0 : i32
    %c0_i32_0 = arith.constant 0 : i32
    %c0_i32_1 = arith.constant 0 : i32
    return %c0_i32, %c0_i32_0 : i32, i32
  }
  func.func @transform_3(%arg0: i32, %arg1: memref<4xi32, #tpu.memory_space<smem>>) -> (i32, i32) {
    %c0_i32 = arith.constant 0 : i32
    %c0_i32_0 = arith.constant 0 : i32
    %c0_i32_1 = arith.constant 0 : i32
    return %c0_i32, %c0_i32_0 : i32, i32
  }
  func.func @transform_4(%arg0: i32, %arg1: memref<4xi32, #tpu.memory_space<smem>>) -> (i32, i32) {
    %c0_i32 = arith.constant 0 : i32
    %c0_i32_0 = arith.constant 0 : i32
    %c0_i32_1 = arith.constant 0 : i32
    return %c0_i32, %c0_i32_0 : i32, i32
  }
  func.func @transform_5(%arg0: i32, %arg1: memref<4xi32, #tpu.memory_space<smem>>) -> (i32, i32) {
    %c0_i32 = arith.constant 0 : i32
    %c0_i32_0 = arith.constant 0 : i32
    %c0_i32_1 = arith.constant 0 : i32
    return %c0_i32, %c0_i32_0 : i32, i32
  }
  func.func @transform_6(%arg0: i32, %arg1: memref<4xi32, #tpu.memory_space<smem>>) -> (i32, i32) {
    %c0_i32 = arith.constant 0 : i32
    %c0_i32_0 = arith.constant 0 : i32
    %c0_i32_1 = arith.constant 0 : i32
    return %c0_i32, %c0_i32_0 : i32, i32
  }
  func.func @transform_7(%arg0: i32, %arg1: memref<4xi32, #tpu.memory_space<smem>>) -> (i32, i32) {
    %c0_i32 = arith.constant 0 : i32
    %c0_i32_0 = arith.constant 0 : i32
    %c0_i32_1 = arith.constant 0 : i32
    return %c0_i32, %c0_i32_0 : i32, i32
  }
  func.func @transform_8(%arg0: i32, %arg1: memref<4xi32, #tpu.memory_space<smem>>) -> (i32, i32) {
    %c0_i32 = arith.constant 0 : i32
    %c0_i32_0 = arith.constant 0 : i32
    %c0_i32_1 = arith.constant 0 : i32
    return %c0_i32, %c0_i32_0 : i32, i32
  }
  func.func @transform_9(%arg0: i32, %arg1: memref<4xi32, #tpu.memory_space<smem>>) -> (i32, i32, i32, i32) {
    %c0_i32 = arith.constant 0 : i32
    %c0_i32_0 = arith.constant 0 : i32
    %c0_i32_1 = arith.constant 0 : i32
    %c0_i32_2 = arith.constant 0 : i32
    %c0_i32_3 = arith.constant 0 : i32
    return %c0_i32, %c0_i32_0, %c0_i32_1, %c0_i32_2 : i32, i32, i32, i32
  }
  func.func @transform_10(%arg0: i32, %arg1: memref<4xi32, #tpu.memory_space<smem>>) -> (i32, i32, i32) {
    %c0_i32 = arith.constant 0 : i32
    %c0_i32_0 = arith.constant 0 : i32
    %c0_i32_1 = arith.constant 0 : i32
    %c0_i32_2 = arith.constant 0 : i32
    return %c0_i32, %c0_i32_0, %c0_i32_1 : i32, i32, i32
  }
  func.func @transform_11(%arg0: i32, %arg1: memref<4xi32, #tpu.memory_space<smem>>) -> (i32, i32, i32, i32) {
    %c0_i32 = arith.constant 0 : i32
    %c0_i32_0 = arith.constant 0 : i32
    %c0_i32_1 = arith.constant 0 : i32
    %c0_i32_2 = arith.constant 0 : i32
    %c0_i32_3 = arith.constant 0 : i32
    return %c0_i32, %c0_i32_0, %c0_i32_1, %c0_i32_2 : i32, i32, i32, i32
  }
  func.func @transform_12(%arg0: i32, %arg1: memref<4xi32, #tpu.memory_space<smem>>) -> (i32, i32) {
    %c0_i32 = arith.constant 0 : i32
    %c0_i32_0 = arith.constant 0 : i32
    %c0_i32_1 = arith.constant 0 : i32
    return %c0_i32, %c0_i32_0 : i32, i32
  }
  func.func @transform_13(%arg0: i32, %arg1: memref<4xi32, #tpu.memory_space<smem>>) -> (i32, i32) {
    %c0_i32 = arith.constant 0 : i32
    %c0_i32_0 = arith.constant 0 : i32
    %c0_i32_1 = arith.constant 0 : i32
    return %c0_i32, %c0_i32_0 : i32, i32
  }
  func.func @transform_14(%arg0: i32, %arg1: memref<4xi32, #tpu.memory_space<smem>>) -> (i32, i32) {
    %c0_i32 = arith.constant 0 : i32
    %c0_i32_0 = arith.constant 0 : i32
    %c0_i32_1 = arith.constant 0 : i32
    return %c0_i32, %c0_i32_0 : i32, i32
  }
  func.func @transform_15(%arg0: i32, %arg1: memref<4xi32, #tpu.memory_space<smem>>) -> (i32, i32) {
    %c0_i32 = arith.constant 0 : i32
    %c0_i32_0 = arith.constant 0 : i32
    %c0_i32_1 = arith.constant 0 : i32
    return %c0_i32, %c0_i32_0 : i32, i32
  }
  func.func @transform_16(%arg0: i32, %arg1: memref<4xi32, #tpu.memory_space<smem>>) -> (i32, i32, i32) {
    %c0_i32 = arith.constant 0 : i32
    %c0_i32_0 = arith.constant 0 : i32
    %c0_i32_1 = arith.constant 0 : i32
    return %arg0, %c0_i32, %c0_i32_0 : i32, i32, i32
  }
  func.func @transform_17(%arg0: i32, %arg1: memref<4xi32, #tpu.memory_space<smem>>) -> (i32, i32, i32) {
    %c0_i32 = arith.constant 0 : i32
    %c0_i32_0 = arith.constant 0 : i32
    %c0_i32_1 = arith.constant 0 : i32
    return %arg0, %c0_i32, %c0_i32_0 : i32, i32, i32
  }
  func.func @transform_18(%arg0: i32, %arg1: memref<4xi32, #tpu.memory_space<smem>>) -> (i32, i32, i32) {
    %c0_i32 = arith.constant 0 : i32
    %c0_i32_0 = arith.constant 0 : i32
    %c0_i32_1 = arith.constant 0 : i32
    return %arg0, %c0_i32, %c0_i32_0 : i32, i32, i32
  }
}

</mosaic_0001>

<bundles_post_ra>
// kernel: decoder_decode.1
= control target key start
LH: loop header
LB: loop body
LE: loop exit
PB: predicated region body
PF: predicated region fallthrough
CT: control target
= control target key end

     0   :  { %s1592_s21 = smov [#allocation6]   ;;  %s2039_s0 = inlined_call_operand.vmem [shape: s32[4], index: 0, kind: input, shape index: {}]   ;;  %s2040_s1 = inlined_call_operand.vmem [shape: s32[1,5], index: 1, kind: input, shape index: {}]   ;;  %s2041_s2 = inlined_call_operand.vmem [shape: f32[5,5], index: 2, kind: input, shape index: {}]   ;;  %s2042_s3 = inlined_call_operand.vmem [shape: f32[1,15], index: 3, kind: input, shape index: {}]   ;;  %s2043_s4 = inlined_call_operand.vmem [shape: f32[1,5], index: 4, kind: input, shape index: {}]   ;;  %s2044_s5 = inlined_call_operand.vmem [shape: f32[5,30], index: 5, kind: input, shape index: {}]   ;;  %s2045_s6 = inlined_call_operand.vmem [shape: f32[20,10], index: 6, kind: input, shape index: {}]   ;;  %s2046_s7 = inlined_call_operand.vmem [shape: f32[10,5], index: 7, kind: input, shape index: {}]   ;;  %s2047_s8 = inlined_call_operand.vmem [shape: f32[15,5], index: 8, kind: input, shape index: {}]   ;;  %s2048_s9 = inlined_call_operand.vmem [shape: f32[1,5], index: 9, kind: input, shape index: {}]   ;;  %s2049_s10 = inlined_call_operand.vmem [shape: f32[3,2,30,15], index: 10, kind: input, shape index: {}]   ;;  %s2050_s11 = inlined_call_operand.vmem [shape: f32[3,15,15], index: 11, kind: input, shape index: {}]   ;;  %s2051_s12 = inlined_call_operand.vmem [shape: f32[2,3,1,15], index: 12, kind: input, shape index: {}]   ;;  %s2052_s13 = inlined_call_operand.vmem [shape: f32[15,20], index: 13, kind: input, shape index: {}]   ;;  %s2053_s14 = inlined_call_operand.vmem [shape: f32[1,20], index: 14, kind: input, shape index: {}]   ;;  %s2054_s15 = inlined_call_operand.vmem [shape: f32[30,15], index: 15, kind: input, shape index: {}]   ;;  %s2055_s16 = inlined_call_operand.vmem [shape: f32[1,15], index: 16, kind: input, shape index: {}]   ;;  %s2056_s17 = inlined_call_operand.vmem [shape: f32[4,1,20], index: 17, kind: output, shape index: {0}]   ;;  %s2057_s18 = inlined_call_operand.hbm [shape: f32[4,1,15], index: 18, kind: output, shape index: {1}]   ;;  %s2058_s19 = inlined_call_operand.hbm [shape: f32[4,1,5], index: 19, kind: output, shape index: {2}]  }
   0x1   :  { %2067 = sst [smem:[#allocation21_spill]] %s2039_s0 }
   0x2   :  { %2068 = sst [smem:[#allocation22_spill]] %s2040_s1 }
   0x3   :  { %2069 = sst [smem:[#allocation23_spill]] %s2041_s2 }
   0x4   :  { %2070 = sst [smem:[#allocation24_spill]] %s2042_s3 }
   0x5   :  { %2071 = sst [smem:[#allocation25_spill]] %s2043_s4 }
   0x6   :  { %2072 = sst [smem:[#allocation26_spill]] %s2044_s5 }
   0x7   :  { %2073 = sst [smem:[#allocation27_spill]] %s2052_s13 }
   0x8   :  { %s2074_s20 = sld [smem:[#allocation21_spill]] }
   0xe   :  { %s26_s13 = sshll.u32 %s2074_s20, 4  ;;  %s27_s13 = int_to_ptr.vmem [resolvable:$true] %s26_s13 }
   0xf   :  { %29 = dma.vmem_to_smem %s27_s13, 16, %s1592_s21, [#allocation5] }
  0x10   :  { %1566 = dma.done.wait [#allocation5], 16 }
  0x11   :  { %1567 = vsyncadd [#allocation5], 4294967280 }
  0x12   :  { %32 = sfence }
  0x13   :  { %33 = vsyncpa [#allocation8], 0 }
  0x14   :  { %35 = vsyncpa [#allocation8 + $0x1], 0 }
  0x15   :  { %36 = vsyncpa [#allocation10], 0 }
  0x16   :  { %38 = vsyncpa [#allocation10 + $0x1], 0  ;;  %s1697_s1 = smov 0   ;;  %s1699_s22 = smov 0  }
  0x17   :  { %s1701_s2 = smov 0   ;;  %s1703_s23 = smov 0  }
  0x18 LB: > { %2075 = sst [smem:[#allocation14_spill]] %s1578_s1  ;;  %s1718_s13 = sadd.s32 4294967295, %s1590_s23   ;;  %s1590_s23 = sphi %s1703_s23, %s2096_s23   ;;  %s1586_s2 = sphi %s1701_s2, %s2099_s2   ;;  %s1582_s22 = sphi %s1699_s22, %s2098_s22   ;;  %s1578_s1 = sphi %s1697_s1, %s2097_s1  }
  0x19   : > { %2076 = sst [smem:[#allocation15_spill]] %s1582_s22  ;;  %s1339_s24 = sadd.s32 4294967294, %s1590_s23  }
  0x1a   : > { %2077 = sst [smem:[#allocation16_spill]] %s1586_s2  ;;  %s1722_s25 = sadd.s32 1, %s1590_s23  }
  0x1b   : > { %2078 = sst [smem:[#allocation17_spill]] %s1590_s23  ;;  %s413_s3 = sadd.s32 1, %s1586_s2 }
  0x1c   : > { %2079 = sst [smem:[#allocation18_spill]] %s1722_s25  ;;  %s410_s26 = ssub.s32 %s1590_s23, %s1722_s25 }
  0x1d   : > { %p423_p0 = scmp.ne.s32.totalorder %s1586_s2, %s1582_s22  ;;  %p411_p1 = scmp.eq.s32.totalorder %s410_s26, 0 }
  0x1e   : > { %p424_p2 = scmp.eq.s32.totalorder %s1718_s13, 3  ;;  %p429_p3 = scmp.ne.s32.totalorder %s1582_s22, %s1578_s1 }
  0x1f   : > { %p430_p4 = scmp.eq.s32.totalorder %s1339_s24, 3  ;;  %p1341_p7 = scmp.ge.s32.totalorder %s1590_s23, 1 }
  0x20   : > { %s1733_s27 = scalar_select %p411_p1, %s1586_s2, %s413_s3  }
  0x21   : > { %p1735_p5 = por %p424_p2, %p423_p0  ;;  %p1739_p6 = por %p430_p4, %p429_p3 }
  0x22   : > { %2080 = sst [smem:[#allocation19_spill]] %s1733_s27  ;;  %p522_p8 = scmp.lt.s32.totalorder %s1590_s23, 5 }
  0x23   : > { %s2082_s29 = scalar_select %p1739_p6, 1, 0 }
  0x24   : > { %p523_p9 = pnand %p1341_p7, %p522_p8 }
  0x25   : > { %2083 = sst [smem:[#allocation20_spill]] %s2082_s29  ;;  %s1746_s0 = sand.u32 (!%p523_p9), 1, %s1582_s22  }
  0x26   : > { %526 = sbr.rel (%p523_p9) target bundleno = 1422 (0x58e), region = 84  ;;  %p577_p10 = scmp.lt.s32.totalorder (!%p523_p9), %s1718_s13, 3 }
  0x27   : > { %s570_s3 = scalar_lea.vmem (!%p523_p9), [#allocation7], %s1746_s0  ;;  %p1342_p11 = scmp.ne.s32.totalorder (!%p523_p9), %s1718_s13, 0 }
  0x2b   : > { %s1750_s30 = scalar_select %p577_p10, %s1718_s13, 3 }
  0x2c   : > { %583 = sbr.rel (%p1342_p11) target bundleno = 193 (0xc1), region = 88  ;;  %s2084_s25 = sld [smem:[#allocation24_spill]] (!%p1342_p11) }
  0x2d   : > { %s579_s24 = scalar_lea.vmem %s2056_s17, %s1750_s30  ;;  %s2085_s4 = sld [smem:[#allocation25_spill]] (!%p1342_p11) }
  0x2e   : > { %s2086_s5 = sld [smem:[#allocation26_spill]] (!%p1342_p11) }
  0x31   : > { %vm585_vm0 = vcmask 114688   ;;  %vm588_vm1 = vcmask 32768   ;;  %v594_v2 = vld [vmem:[%s2054_s15 + $0x18] sm:$0x3f]  ;;  %vm603_vm2 = vcmask 1045504   ;;  %v593_v3 = vld [vmem:[%s2054_s15 + $0x10] sm:$0xff] }
  0x32   : > { %v584_v0 = vld [vmem:[%s2084_s25] sm:$0x1]  ;;  %1343 = vmatpush.msk.msra.mxu0 %vm603_vm2, %v594_v2  ;;  %v592_v4 = vld [vmem:[%s2054_s15 + $0x8] sm:$0xff]  ;;  %vm599_vm3 = vcmask 244736   ;;  %vm628_vm4 = vcmask 118784  }
  0x33   : > { %v587_v1 = vld [vmem:[%s2085_s4] sm:$0x1]  ;;  %586 = vst.msk [vmem:[#allocation2] sm:$0x1] %vm585_vm0, %v584_v0 }
  0x34   : > { %589 = vst.msk [vmem:[#allocation3] sm:$0x1] %vm588_vm1, %v587_v1  ;;  %620 = vmatpush.msra.mxu0 %v593_v3  ;;  %v591_v5 = vld [vmem:[%s2054_s15] sm:$0xff] }
  0x35   : > { %v590_v6 = vld [vmem:[%s2086_s5] sm:$0x1f] }
  0x36   : > { %621 = vmatpush.msra.mxu0 %v592_v4  ;;  %v1457_v7 = vld [vmem:[%s2055_s16] ss:$0 sm:$0xff] }
  0x38   : > { %622 = vmatpush.msra.mxu0 %v591_v5 }
  0x39   : > { %1344 = vmatmul.msk.f32.vlgmr.msra.gmra.mxu0 %vm599_vm3, %v590_v6 }
  0xb6   : > { %v624_v8 = vpop.f32.mrf.mxu0 }
  0xb7   : > { %v625_v9 = vadd.f32 %v1457_v7, %v624_v8 }
  0xb9   : > { %1458 = vtanh.f32 %v625_v9 }
  0xbf   : > { %v1459_v10 = vpop.eup %1458 }
  0xc0   : > { %629 = vst.msk [vmem:[#allocation4] sm:$0x1f] %vm628_vm4, %v1459_v10 }
  0xc1 PF: > { %v638_v11 = vld [vmem:[%s2047_s8 + $0x8] sm:$0x7f]  ;;  %vm643_vm5 = vcmask 1046528   ;;  %vm671_vm6 = vcmask 1041408   ;;  %v637_v13 = vld [vmem:[%s2047_s8] sm:$0xff]  ;;  %vm639_vm7 = vcmask 121856   ;;  %s1231_s1 = scalar_lea.hbm %s2057_s18, %s1718_s13 }
  0xc2   : > { %v636_v12 = vld [vmem:[%s2046_s7 + $0x8] sm:$0x3]  ;;  %1345 = vmatpush.msk.msra.mxu0 %vm643_vm5, %v638_v11  ;;  %v635_v14 = vld [vmem:[%s2046_s7] sm:$0xff]  ;;  %s630_s20 = sld [smem:[#allocation6 + %s1718_s13]]  ;;  %vm667_vm8 = vcmask 80896   ;;  %vm697_vm9 = vcmask 32768  }
  0xc3   : > { %1347 = vmatpush.msk.msra.mxu1 %vm671_vm6, %v636_v12  ;;  %v1796_v15 = vld [vmem:[#allocation2] sm:$0x1]  ;;  %s2087_s23 = sld [smem:[#allocation22_spill]]  ;;  %v1593_v25 = vmov 0.0   ;;  %vm714_vm11 = vcmask 1044480   ;;  %vm710_vm1 = vcmask 39936  }
  0xc4   : > { %662 = vmatpush.msra.mxu0 %v637_v13  ;;  %v695_v19 = vld [vmem:[%s2048_s9] sm:$0x1]  ;;  %s2088_s5 = sld [smem:[#allocation26_spill]]  ;;  %v632_v45 = vld [vmem:[#allocation3] sm:$0x1]  ;;  %vm802_vm2 = vcmask 1045504  }
  0xc5   : > { %690 = vmatpush.msra.mxu1 %v635_v14  ;;  %1346 = vmatmul.msk.f32.vlgmr.msra.gmra.mxu0 %vm639_vm7, %v1796_v15  ;;  %v855_v49 = vld [vmem:[%s2050_s11 + $0x8] sm:$0x7f]  ;;  %v854_v50 = vld [vmem:[%s2050_s11] sm:$0xff]  ;;  %v1357_v51 = vld [vmem:[%s2049_s10 + $0x38] sm:$0x3f]  ;;  %vm798_vm3 = vcmask 244736  }
  0xc6   : > { %1363 = vmatpush.msk.msrb.mxu0 %vm643_vm5, %v855_v49  ;;  %v1372_v52 = vld [vmem:[%s2049_s10 + $0x78] sm:$0x3f]  ;;  %v1356_v53 = vld [vmem:[%s2049_s10 + $0x30] sm:$0xff]  ;;  %v1355_v56 = vld [vmem:[%s2049_s10 + $0x28] sm:$0xff]  ;;  %s2089_s26 = sld [smem:[#allocation27_spill]]  ;;  %s1235_s21 = sshll.u32 %s1231_s1, 4  ;;  %s1236_s21 = int_to_ptr.hbm [resolvable:$true] %s1235_s21 }
  0xc7   : > { %1373 = vmatpush.msk.msrb.mxu1 %vm802_vm2, %v1372_v52  ;;  %v1390_v54 = vld [vmem:[%s2049_s10 + $0xb8] sm:$0x3f]  ;;  %v1371_v55 = vld [vmem:[%s2049_s10 + $0x70] sm:$0xff]  ;;  %v1370_v57 = vld [vmem:[%s2049_s10 + $0x68] sm:$0xff]  ;;  %s2090_s22 = sld [smem:[#allocation23_spill]]  ;;  %s1514_s1 = scalar_lea.hbm %s2057_s18, 4 }
  0xc8   : > { %s633_s25 = scalar_lea.vmem %s2045_s6, %s630_s20  ;;  %v739_v22 = vstv %s630_s20  ;;  %876 = vmatpush.msrb.mxu0 %v854_v50  ;;  %v1389_v58 = vld [vmem:[%s2049_s10 + $0xb0] sm:$0xff]  ;;  %v1388_v59 = vld [vmem:[%s2049_s10 + $0xa8] sm:$0xff]  ;;  %v1354_v61 = vld [vmem:[%s2049_s10 + $0x20] sm:$0xff] }
  0xc9   : > { %v634_v16 = vld [vmem:[%s633_s25] sm:$0x1]  ;;  %907 = vmatpush.msrb.mxu1 %v1371_v55  ;;  %v792_v0 = vld [vmem:[%s2049_s10 + $0x18] sm:$0x3f]  ;;  %v791_v2 = vld [vmem:[%s2049_s10 + $0x10] sm:$0xff]  ;;  %s1216_s25 = scalar_lea.sflag [#allocation8], %s1746_s0 }
  0xca   : > { %1348 = vmatmul.msk.f32.vlgmr.msra.gmra.mxu1 %vm667_vm8, %v634_v16  ;;  %v738_v21 = vld [vmem:[%s2087_s23] sm:$0x1]  ;;  %1391 = vmatpush.msk.msra.mxu0 %vm802_vm2, %v1390_v54  ;;  %v1386_v1 = vld [vmem:[%s2049_s10 + $0x98] sm:$0x3f]  ;;  %v1385_v3 = vld [vmem:[%s2049_s10 + $0x90] sm:$0xff]  ;;  %s1233_s23 = sshll.u32 %s570_s3, 4  ;;  %s1234_s23 = int_to_ptr.vmem [resolvable:$true] %s1233_s23 }
  0xcb   : > { %vm740_vm10 = vcmp.eq.s32.totalorder %v738_v21, %v739_v22  ;;  %v709_v28 = vld [vmem:[%s2088_s5] sm:$0x1f]  ;;  %908 = vmatpush.msrb.mxu1 %v1370_v57  ;;  %v790_v4 = vld [vmem:[%s2049_s10 + $0x8] sm:$0xff]  ;;  %v1368_v8 = vld [vmem:[%s2049_s10 + $0x58] sm:$0x3f] }
  0xcc   : > { %v1351_v26 = vsel %vm740_vm10, 1.0, %v1593_v25  ;;  %1352 = vmatpush.msk.msra.mxu3 %vm714_vm11, %v709_v28  ;;  %1349 = vmatpush.msk.msra.mxu2 %vm714_vm11, %v709_v28  ;;  %v1369_v62 = vld [vmem:[%s2049_s10 + $0x60] sm:$0xff]  ;;  %v1384_v5 = vld [vmem:[%s2049_s10 + $0x88] sm:$0xff]  ;;  %v1367_v10 = vld [vmem:[%s2049_s10 + $0x50] sm:$0xff] }
  0xcd   : > { %v743_v27 = vsel %vm697_vm9, %v1351_v26, 0.0  ;;  %1364 = vmatmul.msk.f32.vlgmr.msrb.gmra.mxu0 %vm639_vm7, %v1796_v15  ;;  %v1387_v63 = vld [vmem:[%s2049_s10 + $0xa0] sm:$0xff]  ;;  %909 = vmatpush.msrb.mxu1 %v1369_v62  ;;  %v1366_v11 = vld [vmem:[%s2049_s10 + $0x48] sm:$0xff]  ;;  %v1379_v16 = vld [vmem:[%s2050_s11 + $0x18] sm:$0x7f] }
  0xce   : > { %1358 = vmatpush.msk.msrb.mxu2 %vm802_vm2, %v1357_v51  ;;  %994 = vmatpush.msra.mxu0 %v1389_v58  ;;  %v789_v9 = vld [vmem:[%s2049_s10] sm:$0xff] }
  0xcf   : > { %1360 = vmatpush.msk.msrb.mxu3 %vm802_vm2, %v792_v0  ;;  %1393 = vmatpush.msk.msra.mxu1 %vm802_vm2, %v1386_v1  ;;  %v1365_v13 = vld [vmem:[%s2049_s10 + $0x40] sm:$0xff] }
  0xd0   : > { %819 = vmatpush.msrb.mxu2 %v1356_v53  ;;  %995 = vmatpush.msra.mxu0 %v1388_v59  ;;  %v1383_v14 = vld [vmem:[%s2049_s10 + $0x80] sm:$0xff] }
  0xd1   : > { %845 = vmatpush.msrb.mxu3 %v791_v2  ;;  %1017 = vmatpush.msra.mxu1 %v1385_v3  ;;  %v1362_v22 = vld [vmem:[%s2051_s12 + $0x3] sm:$0x1]  ;;  %v852_v25 = vld [vmem:[%s2051_s12] sm:$0x1]  ;;  %v1398_v52 = vld [vmem:[%s2051_s12 + $0x5] sm:$0x1] }
  0xd2   : > { %820 = vmatpush.msrb.mxu2 %v1355_v56  ;;  %996 = vmatpush.msra.mxu0 %v1387_v63 }
  0xd3   : > { %846 = vmatpush.msrb.mxu3 %v790_v4  ;;  %1018 = vmatpush.msra.mxu1 %v1384_v5 }
  0xd4   : > { %821 = vmatpush.msrb.mxu2 %v1354_v61 }
  0xd5   : > { %847 = vmatpush.msrb.mxu3 %v789_v9  ;;  %1019 = vmatpush.msra.mxu1 %v1383_v14 }
 0x142   : > { %v664_v17 = vpop.f32.mrf.mxu0 }
 0x147   : > { %v692_v18 = vpop.f32.mrf.mxu1 }
 0x148   : > { %v693_v20 = vadd.f32 %v692_v18, %v664_v17  ;;  %v1378_v17 = vld [vmem:[%s2050_s11 + $0x10] sm:$0xff]  ;;  %v1397_v18 = vld [vmem:[%s2050_s11 + $0x28] sm:$0x7f] }
 0x14a   : > { %v696_v23 = vadd.f32 %v695_v19, %v693_v20  ;;  %v1396_v19 = vld [vmem:[%s2050_s11 + $0x20] sm:$0xff] }
 0x14c   : > { %v698_v24 = vsel %vm697_vm9, %v696_v23, -inf }
 0x14d   : > { %699 = vmax.xlane.f32.xlu0 %v698_v24 }
 0x155   : > { %744 = vadd.xlane.f32.xlu0 %v743_v27 }
 0x1c0   : > { %v700_v29 = vpop.xlane.xlu0 %699 }
 0x1c1   : > { %v701_v30 = vsub.f32 %v696_v23, %v700_v29  ;;  %v878_v23 = vpop.f32.mrf.mxu0 }
 0x1c3   : > { %v702_v31 = vmul.f32 1.442695, %v701_v30 }
 0x1c5   : > { %1460 = vpow2.f32 %v702_v31 }
 0x1c8   : > { %v745_v32 = vpop.xlane.xlu0 %744 }
 0x1c9   : > { %1462 = vrcp.f32 %v745_v32  ;;  %v758_v37 = vand.u32 2147483648, %v745_v32  ;;  %vm752_vm12 = vweird.f32 %v745_v32  ;;  %v756_v39 = vand.u32 2147483647, %v745_v32 }
 0x1ca   : > { %vm746_vm0 = vcmp.gt.f32.partialorder %v745_v32, 1.0 }
 0x1cb   : > { %v1817_v33 = vpop.eup %1460  ;;  %v759_v41 = vor.u32 1.1754944e-38, %v758_v37  ;;  %vm757_vm15 = vcmp.eq.f32.partialorder %v756_v39, 8.507059e+37 }
 0x1cc   : > { %v704_v34 = vsel %vm697_vm9, %v1817_v33, 0.0 }
 0x1cd   : > { %705 = vadd.xlane.f32.xlu1 %v704_v34  ;;  %v1380_v34 = vld [vmem:[%s2051_s12 + $0x4] sm:$0x1] }
 0x1cf   : > { %v1463_v35 = vpop.eup %1462 }
 0x1d0   : > { %v748_v36 = vmul.f32 %v1463_v35, %v745_v32  ;;  %vm753_vm13 = vweird.f32 %v1463_v35 }
 0x1d1   : > { %vm754_vm14 = vmor %vm752_vm12, %vm753_vm13 }
 0x1d2   : > { %v749_v38 = vsub.f32 1.0, %v748_v36 }
 0x1d4   : > { %v750_v40 = vmul.f32 %v1463_v35, %v749_v38 }
 0x1d6   : > { %v751_v42 = vadd.f32 %v1463_v35, %v750_v40 }
 0x1d8   : > { %v755_v43 = vsel %vm754_vm14, %v1463_v35, %v751_v42  ;;  %v1102_v42 = vld [vmem:[%s2089_s26] sm:$0xff] }
 0x1d9   : > { %v760_v44 = vsel %vm757_vm15, %v759_v41, %v755_v43  ;;  %v1103_v41 = vld [vmem:[%s2089_s26 + $0x8] sm:$0x7f]  ;;  %v1131_v43 = vld [vmem:[#allocation4] sm:$0x1f]  ;;  %vm1206_vm15 = vcmask 114688  }
 0x1da   : > { %v761_v46 = vmul.f32 %v1351_v26, %v760_v44  ;;  %1405 = vmatpush.xpose.msk.msrb.mxu0 %vm639_vm7, %v1131_v43 }
 0x1dc   : > { %v764_v47 = vsel %vm746_vm0, %v761_v46, %v1351_v26  ;;  %v879_v26 = vadd.f32 %v1362_v22, %v878_v23  ;;  %v1104_v22 = vld [vmem:[%s2053_s14] sm:$0x1]  ;;  %vm1155_vm0 = vcmask 155648  }
 0x1dd   : > { %v765_v48 = vmul.f32 %v764_v47, %v632_v45 }
 0x1df   : > { %1353 = vmatmul.msk.f32.vlgmr.msra.gmra.mxu3 %vm710_vm1, %v765_v48 }
 0x1e0   : > { %1381 = vmatpush.msk.msra.mxu3 %vm643_vm5, %v1379_v16 }
 0x1e2   : > { %963 = vmatpush.msra.mxu3 %v1378_v17 }
 0x240   : > { %v706_v60 = vpop.xlane.xlu1 %705 }
 0x241   : > { %1464 = vrcp.f32 %v706_v60  ;;  %v1395_v60 = vld [vmem:[%s2051_s12 + $0x2] sm:$0x1] }
 0x247   : > { %v1465_v6 = vpop.eup %1464 }
 0x248   : > { %v708_v7 = vmul.f32 %v1465_v6, %v1817_v33  ;;  %v1377_v33 = vld [vmem:[%s2051_s12 + $0x1] sm:$0x1] }
 0x24a   : > { %1350 = vmatmul.msk.f32.vlgmr.msra.gmra.mxu2 %vm710_vm1, %v708_v7 }
 0x24b   : > { %1375 = vmatpush.msk.msra.mxu2 %vm802_vm2, %v1368_v8 }
 0x24d   : > { %930 = vmatpush.msra.mxu2 %v1367_v10 }
 0x24f   : > { %931 = vmatpush.msra.mxu2 %v1366_v11 }
 0x251   : > { %932 = vmatpush.msra.mxu2 %v1365_v13 }
 0x262   : > { %v786_v12 = vpop.f32.mrf.mxu3 }
 0x263   : > { %1359 = vmatmul.msk.f32.vlgmr.msrb.gmra.mxu2 %vm798_vm3, %v786_v12  ;;  %1374 = vmatmul.msk.f32.vlgmr.msrb.gmra.mxu1 %vm798_vm3, %v786_v12 }
 0x264   : > { %1392 = vmatmul.msk.f32.vlgmr.msra.gmra.mxu0 %vm798_vm3, %v786_v12  ;;  %1399 = vmatpush.msk.msrb.mxu2 %vm643_vm5, %v1397_v18 }
 0x266   : > { %1050 = vmatpush.msrb.mxu2 %v1396_v19 }
 0x2cd   : > { %v735_v20 = vpop.f32.mrf.mxu2 }
 0x2ce   : > { %1361 = vmatmul.msk.f32.vlgmr.msrb.gmra.mxu3 %vm798_vm3, %v735_v20  ;;  %1376 = vmatmul.msk.f32.vlgmr.msra.gmra.mxu2 %vm798_vm3, %v735_v20 }
 0x2cf   : > { %1394 = vmatmul.msk.f32.vlgmr.msra.gmra.mxu1 %vm798_vm3, %v735_v20  ;;  %1403 = vmatpush.msk.msrb.mxu3 %vm643_vm5, %v1103_v41 }
 0x2d1   : > { %1126 = vmatpush.msrb.mxu3 %v1102_v42 }
 0x2d6   : > { %1382 = vmatmul.msk.f32.vlgmr.msra.gmra.mxu3 %vm639_vm7, %v1796_v15  ;;  %1400 = vmatmul.msk.f32.vlgmr.msrb.gmra.mxu2 %vm639_vm7, %v1796_v15 }
 0x2e0   : > { %v911_v30 = vpop.f32.mrf.mxu1 }
 0x2e1   : > { %v998_v55 = vpop.f32.mrf.mxu0 }
 0x2e6   : > { %v823_v21 = vpop.f32.mrf.mxu2 }
 0x34c   : > { %v1021_v50 = vpop.f32.mrf.mxu1 }
 0x34d   : > { %v1022_v59 = vadd.f32 %v1021_v50, %v998_v55 }
 0x34f   : > { %v1026_v3 = vadd.f32 %v1395_v60, %v1022_v59 }
 0x351   : > { %v849_v24 = vpop.f32.mrf.mxu3  ;;  %v934_v28 = vpop.f32.mrf.mxu2 }
 0x352   : > { %v850_v27 = vadd.f32 %v849_v24, %v823_v21  ;;  %v935_v32 = vadd.f32 %v934_v28, %v911_v30 }
 0x354   : > { %v853_v29 = vadd.f32 %v852_v25, %v850_v27  ;;  %v939_v37 = vadd.f32 %v1377_v33, %v935_v32 }
 0x356   : > { %v1055_v31 = vadd.f32 %v879_v26, %v853_v29 }
 0x358   : > { %v1401_v35 = vmul.f32 -1.442695, %v1055_v31 }
 0x359   : > { %v965_v36 = vpop.f32.mrf.mxu3  ;;  %v1052_v53 = vpop.f32.mrf.mxu2 }
 0x35a   : > { %1466 = vpow2.f32 %v1401_v35  ;;  %v966_v38 = vadd.f32 %v1380_v34, %v965_v36  ;;  %v1053_v62 = vadd.f32 %v1398_v52, %v1052_v53  ;;  %v1179_v36 = vld [vmem:[%s2090_s22] sm:$0x1f]  ;;  %s1508_s22 = sshra.s32 %s1236_s21, 4  ;;  %s1509_s22 = int_to_ptr.hbm [resolvable:$true] %s1508_s22 }
 0x35b   : > { %1407 = vmatpush.msk.msrb.mxu1 %vm714_vm11, %v1179_v36  ;;  %s1510_s27 = scalar_lea.hbm %s1509_s22, 1  ;;  %p1515_p1 = scmp.lt.s32.totalorder %s1509_s22, %s2057_s18 }
 0x35c   : > { %v1075_v39 = vadd.f32 %v966_v38, %v939_v37  ;;  %p1511_p12 = scmp.ne.s32.totalorder %s1509_s22, %s1510_s27  ;;  %p1516_p2 = scmp.lt.s32.totalorder %s1514_s1, %s1510_s27 }
 0x35e   : > { %v1402_v40 = vmul.f32 -1.442695, %v1075_v39  ;;  %p1512_p13 = pnand %p1511_p12, %p1735_p5  ;;  %p1517_p3 = por %p1516_p2, %p1515_p1 }
 0x360   : > { %v1467_v44 = vpop.eup %1466  ;;  %1468 = vpow2.f32 %v1402_v40  ;;  %p1513_p0 = pneg %p1512_p13 }
 0x361   : > { %v1059_v45 = vadd.f32 1.0, %v1467_v44 }
 0x362   : > { %p1518_p4 = pnand %p1517_p3, %p1513_p0 }
 0x363   : > { %1470 = vrcp.f32 %v1059_v45  ;;  %v1071_v54 = vand.u32 2147483648, %v1059_v45  ;;  %v1069_v57 = vand.u32 2147483647, %v1059_v45  ;;  %vm1065_vm5 = vweird.f32 %v1059_v45 }
 0x365   : > { %v1072_v0 = vor.u32 1.1754944e-38, %v1071_v54  ;;  %vm1070_vm8 = vcmp.eq.f32.partialorder %v1069_v57, 8.507059e+37 }
 0x366   : > { %v1469_v46 = vpop.eup %1468 }
 0x367   : > { %v1079_v47 = vadd.f32 1.0, %v1469_v46 }
 0x369   : > { %v1471_v48 = vpop.eup %1470  ;;  %1472 = vrcp.f32 %v1079_v47  ;;  %v1091_v6 = vand.u32 2147483648, %v1079_v47  ;;  %v1089_v8 = vand.u32 2147483647, %v1079_v47  ;;  %vm1085_vm12 = vweird.f32 %v1079_v47 }
 0x36a   : > { %v1061_v49 = vmul.f32 %v1471_v48, %v1059_v45  ;;  %vm1066_vm4 = vweird.f32 %v1471_v48 }
 0x36b   : > { %vm1067_vm6 = vmor %vm1065_vm5, %vm1066_vm4  ;;  %v1092_v11 = vor.u32 1.1754944e-38, %v1091_v6  ;;  %vm1090_vm14 = vcmp.eq.f32.partialorder %v1089_v8, 8.507059e+37 }
 0x36c   : > { %v1062_v51 = vsub.f32 1.0, %v1061_v49 }
 0x36e   : > { %v1063_v56 = vmul.f32 %v1471_v48, %v1062_v51 }
 0x36f   : > { %v1473_v58 = vpop.eup %1472 }
 0x370   : > { %v1081_v61 = vmul.f32 %v1473_v58, %v1079_v47  ;;  %v1064_v63 = vadd.f32 %v1471_v48, %v1063_v56  ;;  %vm1086_vm10 = vweird.f32 %v1473_v58 }
 0x371   : > { %vm1087_vm13 = vmor %vm1085_vm12, %vm1086_vm10 }
 0x372   : > { %v1082_v1 = vsub.f32 1.0, %v1081_v61  ;;  %v1068_v2 = vsel %vm1067_vm6, %v1471_v48, %v1064_v63 }
 0x373   : > { %v1073_v4 = vsel %vm1070_vm8, %v1072_v0, %v1068_v2 }
 0x374   : > { %v1083_v5 = vmul.f32 %v1473_v58, %v1082_v1  ;;  %v1095_v7 = vmul.f32 %v1073_v4, %v1053_v62 }
 0x376   : > { %v1084_v9 = vadd.f32 %v1473_v58, %v1083_v5  ;;  %v1096_v10 = vadd.f32 %v1095_v7, %v1026_v3 }
 0x378   : > { %v1088_v12 = vsel %vm1087_vm13, %v1473_v58, %v1084_v9  ;;  %1474 = vtanh.f32 %v1096_v10 }
 0x379   : > { %v1093_v13 = vsel %vm1090_vm14, %v1092_v11, %v1088_v12 }
 0x37a   : > { %v1098_v14 = vsub.f32 1.0, %v1093_v13  ;;  %v1100_v18 = vmul.f32 %v1093_v13, %v1796_v15 }
 0x37e   : > { %v1475_v16 = vpop.eup %1474 }
 0x37f   : > { %v1099_v17 = vmul.f32 %v1475_v16, %v1098_v14 }
 0x381   : > { %v1101_v19 = vadd.f32 %v1100_v18, %v1099_v17 }
 0x383   : > { %1404 = vmatmul.msk.f32.vlgmr.msrb.gmra.mxu3 %vm639_vm7, %v1101_v19  ;;  %1406 = vmatmul.msk.f32.vlgmr.msrb.gmra.mxu0 %vm639_vm7, %v1101_v19  ;;  %1207 = vst.msk [vmem:[#allocation2] sm:$0x1] %vm1206_vm15, %v1101_v19 }
 0x384   : > { %1210 = vst.msk [vmem:[%s570_s3] sm:$0x1] %vm1206_vm15, %v1101_v19 }
 0x400   : > { %v1152_v20 = vpop.f32.mrf.mxu0 }
 0x401   : > { %v1159_v21 = vsel %vm697_vm9, %v1152_v20, -inf }
 0x402   : > { %1160 = vmax.xlane.f32.xlu2 %v1159_v21 }
 0x406   : > { %v1128_v23 = vpop.f32.mrf.mxu3 }
 0x407   : > { %v1129_v15 = vadd.f32 %v1128_v23, %v1104_v22 }
 0x409   : > { %v1156_v24 = vsel %vm1155_vm0, %v1129_v15, -inf }
 0x40a   : > { %1157 = vmax.xlane.f32.xlu1 %v1156_v24 }
 0x475   : > { %v1161_v25 = vpop.xlane.xlu2 %1160 }
 0x47d   : > { %v1158_v26 = vpop.xlane.xlu1 %1157 }
 0x47e   : > { %v1162_v27 = vmax.f32 %v1158_v26, %v1161_v25 }
 0x480   : > { %v1163_v28 = vsub.f32 %v1129_v15, %v1162_v27  ;;  %v1166_v29 = vsub.f32 %v1152_v20, %v1162_v27 }
 0x482   : > { %v1164_v30 = vmul.f32 1.442695, %v1163_v28  ;;  %v1167_v31 = vmul.f32 1.442695, %v1166_v29 }
 0x484   : > { %1476 = vpow2.f32 %v1164_v30 }
 0x485   : > { %1478 = vpow2.f32 %v1167_v31 }
 0x48a   : > { %v1477_v32 = vpop.eup %1476 }
 0x48b   : > { %v1479_v33 = vpop.eup %1478  ;;  %v1169_v34 = vsel %vm1155_vm0, %v1477_v32, 0.0 }
 0x48c   : > { %v1172_v35 = vsel %vm697_vm9, %v1479_v33, 0.0  ;;  %1170 = vadd.xlane.f32.xlu2 %v1169_v34 }
 0x48d   : > { %1173 = vadd.xlane.f32.xlu0 %v1172_v35 }
 0x4ff   : > { %v1171_v37 = vpop.xlane.xlu2 %1170 }
 0x500   : > { %v1174_v38 = vpop.xlane.xlu0 %1173 }
 0x501   : > { %v1175_v39 = vadd.f32 %v1174_v38, %v1171_v37 }
 0x503   : > { %1480 = vrcp.f32 %v1175_v39 }
 0x509   : > { %v1481_v40 = vpop.eup %1480 }
 0x50a   : > { %v1177_v41 = vmul.f32 %v1481_v40, %v1477_v32  ;;  %v1178_v42 = vmul.f32 %v1481_v40, %v1479_v33 }
 0x50c   : > { %1209 = vst.msk [vmem:[%s579_s24] sm:$0x1] %vm1155_vm0, %v1177_v41  ;;  %1408 = vmatmul.msk.f32.vlgmr.msrb.gmra.mxu1 %vm710_vm1, %v1178_v42 }
 0x50d   : > { %1521 = shalt.err (!%p1518_p4)
}
 0x50e   : > { %1411 = dma.vmem_to_hbm [thread:$0]  (%p1735_p5), %s1234_s23, 16, %s1236_s21, %s1216_s25  }
 0x50f   : > { %s1244_s2 = scalar_lea.hbm %s2058_s19, %s1718_s13  ;;  %s2091_s20 = scalar_lea.vmem [#allocation9], %s1746_s0 }
 0x510   : > { %s1246_s3 = sshll.u32 %s2091_s20, 4  ;;  %s1248_s4 = sshll.u32 %s1244_s2, 4  ;;  %s1247_s3 = int_to_ptr.vmem [resolvable:$true] %s1246_s3  ;;  %s1249_s4 = int_to_ptr.hbm [resolvable:$true] %s1248_s4 }
 0x511   : > { %s2092_s5 = smov %s2091_s20  ;;  %s1220_s22 = scalar_lea.sflag [#allocation10], %s1746_s0 }
 0x512   : > { %s1536_s27 = sshra.s32 %s1249_s4, 4  ;;  %s1542_s21 = scalar_lea.hbm %s2058_s19, 4  ;;  %s1537_s27 = int_to_ptr.hbm [resolvable:$true] %s1536_s27 }
 0x513   : > { %s1538_s29 = scalar_lea.hbm %s1537_s27, 1  ;;  %p1543_p10 = scmp.lt.s32.totalorder %s1537_s27, %s2058_s19 }
 0x514   : > { %p1539_p7 = scmp.ne.s32.totalorder %s1537_s27, %s1538_s29  ;;  %p1544_p11 = scmp.lt.s32.totalorder %s1542_s21, %s1538_s29 }
 0x516   : > { %p1540_p8 = pnand %p1539_p7, %p1735_p5  ;;  %p1545_p12 = por %p1544_p11, %p1543_p10 }
 0x518   : > { %p1541_p9 = pneg %p1540_p8 }
 0x51a   : > { %p1546_p13 = pnand %p1545_p12, %p1541_p9 }
 0x589   : > { %v1203_v43 = vpop.f32.mrf.mxu1 }
 0x58a   : > { %1208 = vst.msk [vmem:[#allocation3] sm:$0x1] %vm697_vm9, %v1203_v43 }
 0x58b   : > { %1211 = vst.msk [vmem:[%s2092_s5] sm:$0x1] %vm697_vm9, %v1203_v43 }
 0x58c   : > { %1549 = shalt.err (!%p1546_p13)
}
 0x58d   : > { %1412 = dma.vmem_to_hbm [thread:$0]  (%p1735_p5), %s1247_s3, 16, %s1249_s4, %s1220_s22  }
 0x58e PF: > { %s2093_s0 = sld [smem:[#allocation17_spill]] }
 0x58f   : > { %s2094_s30 = sld [smem:[#allocation14_spill]] }
 0x594   : > { %p1422_p0 = scmp.ge.s32.totalorder %s2093_s0, 2 }
 0x595   : > { %s1266_s2 = sand.u32 1, %s2094_s30  }
 0x596   : > { %p1416_p1 = pnand %p1422_p0, %p1739_p6  ;;  %s1267_s20 = scalar_lea.sflag [#allocation8], %s1266_s2 }
 0x598   : > { %p1417_p2 = pneg %p1416_p1 }
 0x59a   : > { %1569 = dma.done.wait (%p1417_p2), %s1267_s20, 16  }
 0x59b   : > { %1571 = vsyncadd (%p1417_p2), %s1267_s20, 4294967280  ;;  %s1276_s5 = scalar_lea.sflag [#allocation10], %s1266_s2 }
 0x59c   : > { %1573 = dma.done.wait (%p1417_p2), %s1276_s5, 16  }
 0x59d   : > { %1575 = vsyncadd (%p1417_p2), %s1276_s5, 4294967280  ;;  %s2096_s23 = sld [smem:[#allocation18_spill]] }
 0x59e   : > { %s2097_s1 = sld [smem:[#allocation15_spill]] }
 0x59f   : > { %s2098_s22 = sld [smem:[#allocation16_spill]] }
 0x5a0   : > { %s2099_s2 = sld [smem:[#allocation19_spill]] }
 0x5a3   : > { %p41_p5 = scmp.ge.s32.totalorder %s2096_s23, 6  }
 0x5a5   :  { %43 = sbr.rel (!%p41_p5) target bundleno = 24 (0x18), region = 162 }
 0x5aa   :  { %1281 = vsyncpa [#allocation8], 1 }
 0x5ab   :  { %1283 = vsyncpa [#allocation8 + $0x1], 1 }
 0x5ac   :  { %1284 = vsyncpa [#allocation10], 1 }
 0x5ad   :  { %1286 = vsyncpa [#allocation10 + $0x1], 1 }

</bundles_post_ra>
